<compile_context>
chip_gen: v5e
topology: v5e:2x2
jax: 0.10.0
libtpu: 0.0.40
codegen_flags: <defaults>
</compile_context>

<pallas_src>
import functools

import jax
import jax.numpy as jnp
from jax.experimental import pallas as pl
from jax.experimental.pallas import tpu as pltpu

LEAK = 0.01    # F.leaky_relu default negative_slope
EPS = 1e-5     # nn.LayerNorm default eps
_Z0 = 8        # sublane-aligned row offset of z inside the zero-padded scratch


def _layernorm_lrelu(x, lnw, lnb):
    """Single-pass LayerNorm over the channel (lane) axis + leaky ReLU (f32)."""
    mu = jnp.mean(x, axis=-1, keepdims=True)
    ex2 = jnp.mean(x * x, axis=-1, keepdims=True)
    var = jnp.maximum(ex2 - mu * mu, 0.0)
    z = (x - mu) * jax.lax.rsqrt(var + EPS) * lnw + lnb
    return jnp.where(z >= 0, z, LEAK * z)


def _apply_residual_blocks(x, lnw_ref, lnb_ref, w_ref, zpad_ref):
    """n_blocks x [x <- x + conv3_s1_p1(leaky_relu(LN(x)))] on x: (T, C) f32.

    lnw/lnb : (n_blocks, C) f32
    w_ref   : (n_blocks*3, C, C) compute-dtype; entry i*3+k = tap k of block i
    zpad_ref: (_Z0 + T + 1, C) f32 scratch; rows _Z0-1 and _Z0+T are conv zero pad
    """
    T, C = x.shape
    n_blocks = lnw_ref.shape[0]
    wdt = w_ref.dtype

    zero_row = jnp.zeros((1, C), zpad_ref.dtype)
    zpad_ref[_Z0 - 1:_Z0, :] = zero_row             # z[-1] = 0
    zpad_ref[_Z0 + T:_Z0 + T + 1, :] = zero_row     # z[T]  = 0

    def body(i, x):
        z = _layernorm_lrelu(x, lnw_ref[pl.ds(i, 1), :], lnb_ref[pl.ds(i, 1), :])
        zpad_ref[_Z0:_Z0 + T, :] = z                # f32 scratch store
        acc = x
        # one accumulated MXU matmul per tap (no lane-axis concat temporary)
        for k in range(3):                          # static: 3 taps
            tap = zpad_ref[pl.ds(_Z0 + k - 1, T), :].astype(wdt)
            acc = acc + jnp.dot(tap, w_ref[i * 3 + k],
                                preferred_element_type=jnp.float32)
        return acc

    return jax.lax.fori_loop(0, n_blocks, body, x)


# ---------------------------------------------------------------------------
# Kernels
# ---------------------------------------------------------------------------
def _down_block_kernel(x_ref, rlnw_ref, rlnb_ref, rw_ref,
                       dlnw_ref, dlnb_ref, dw_ref, o_ref, zpad_ref):
    """Fused DownBlock: 2x residual(conv3) then LN->lrelu->conv4/stride2."""
    T, C = x_ref.shape[1], x_ref.shape[2]
    Tout = T // 2
    wdt = dw_ref.dtype

    x = x_ref[0].astype(jnp.float32)                                   # (T, C)
    x = _apply_residual_blocks(x, rlnw_ref, rlnb_ref, rw_ref, zpad_ref)

    # DownsampleBlock: out[t] = sum_k w_k @ z[2t + k - 1], z[-1]=z[T]=0.
    z = _layernorm_lrelu(x, dlnw_ref[...], dlnb_ref[...])              # (T, C)
    zpad_ref[_Z0:_Z0 + T, :] = z       # pad rows _Z0-1 / _Z0+T already zeroed
    out = jnp.dot(zpad_ref[pl.ds(_Z0, Tout, 2), :].astype(wdt), dw_ref[1],
                  preferred_element_type=jnp.float32)   # aligned tap first
    for k in (0, 2, 3):                                 # static: 3 shifted taps
        tap = zpad_ref[pl.ds(_Z0 + k - 1, Tout, 2), :].astype(wdt)
        out = out + jnp.dot(tap, dw_ref[k], preferred_element_type=jnp.float32)
    o_ref[0] = out.astype(o_ref.dtype)


def _residual_chain_kernel(x_ref, lnw_ref, lnb_ref, w_ref, o_ref, zpad_ref):
    """MiddleBlock: 4 fused residual blocks (2 ResNetBlocks)."""
    x = x_ref[0].astype(jnp.float32)
    x = _apply_residual_blocks(x, lnw_ref, lnb_ref, w_ref, zpad_ref)
    o_ref[0] = x.astype(o_ref.dtype)


# ---------------------------------------------------------------------------
# Pallas wrappers
# ---------------------------------------------------------------------------
def _vmem_limit(block_bytes, scratch_bytes):
    # double-buffered pipeline blocks + scratch, with generous headroom
    return int(min(max(4 * (2 * block_bytes + scratch_bytes), 8 << 20), 64 << 20))


def down_block(x, rp, dp, compute_dtype):
    """One fused DownBlock (ResNetBlock + DownsampleBlock) pallas_call."""
    B, T, C = x.shape
    assert T % 2 == 0
    Tout = T // 2
    N = rp["lnw"].shape[0]
    Cout = dp["w"].shape[-1]
    rw = rp["w"].reshape(N * 3, C, C).astype(compute_dtype)
    dw = dp["w"].astype(compute_dtype)                      # (4, C, Cout)
    cds = jnp.dtype(compute_dtype).itemsize
    block_bytes = ((T * C + Tout * Cout) * 4
                   + (3 * N * C * C + 4 * C * Cout) * cds
                   + (2 * N + 2) * C * 4)
    scratch_bytes = (_Z0 + T + 1) * C * 4
    return pl.pallas_call(
        _down_block_kernel,
        out_shape=jax.ShapeDtypeStruct((B, Tout, Cout), x.dtype),
        grid=(B,),
        in_specs=[
            pl.BlockSpec((1, T, C), lambda b: (b, 0, 0)),
            pl.BlockSpec((N, C), lambda b: (0, 0)),
            pl.BlockSpec((N, C), lambda b: (0, 0)),
            pl.BlockSpec((N * 3, C, C), lambda b: (0, 0, 0)),
            pl.BlockSpec((1, C), lambda b: (0, 0)),
            pl.BlockSpec((1, C), lambda b: (0, 0)),
            pl.BlockSpec((4, C, Cout), lambda b: (0, 0, 0)),
        ],
        out_specs=pl.BlockSpec((1, Tout, Cout), lambda b: (b, 0, 0)),
        scratch_shapes=[pltpu.VMEM((_Z0 + T + 1, C), jnp.float32)],
        compiler_params=pltpu.CompilerParams(
            dimension_semantics=("parallel",),
            vmem_limit_bytes=_vmem_limit(block_bytes, scratch_bytes)),
    )(x, rp["lnw"], rp["lnb"], rw, dp["lnw"], dp["lnb"], dw)


def residual_chain(x, p, compute_dtype):
    """MiddleBlock: fused chain of residual blocks, one pallas_call."""
    B, T, C = x.shape
    N = p["lnw"].shape[0]
    w = p["w"].reshape(N * 3, C, C).astype(compute_dtype)
    cds = jnp.dtype(compute_dtype).itemsize
    block_bytes = 2 * T * C * 4 + 3 * N * C * C * cds + 2 * N * C * 4
    scratch_bytes = (_Z0 + T + 1) * C * 4
    return pl.pallas_call(
        _residual_chain_kernel,
        out_shape=jax.ShapeDtypeStruct((B, T, C), x.dtype),
        grid=(B,),
        in_specs=[
            pl.BlockSpec((1, T, C), lambda b: (b, 0, 0)),
            pl.BlockSpec((N, C), lambda b: (0, 0)),
            pl.BlockSpec((N, C), lambda b: (0, 0)),
            pl.BlockSpec((N * 3, C, C), lambda b: (0, 0, 0)),
        ],
        out_specs=pl.BlockSpec((1, T, C), lambda b: (b, 0, 0)),
        scratch_shapes=[pltpu.VMEM((_Z0 + T + 1, C), jnp.float32)],
        compiler_params=pltpu.CompilerParams(
            dimension_semantics=("parallel",),
            vmem_limit_bytes=_vmem_limit(block_bytes, scratch_bytes)),
    )(x, p["lnw"], p["lnb"], w)


# ---------------------------------------------------------------------------
# Parameter init (stored f32; cast to the MXU compute dtype at call time)
# ---------------------------------------------------------------------------
def _init_residual_stack(key, C, n_blocks):
    k1, k2, k3 = jax.random.split(key, 3)
    return {
        "lnw": 1.0 + 0.1 * jax.random.normal(k1, (n_blocks, C), jnp.float32),
        "lnb": 0.1 * jax.random.normal(k2, (n_blocks, C), jnp.float32),
        # (n_blocks, 3, Cin, Cout): tap-major per block
        "w": jax.random.normal(k3, (n_blocks, 3, C, C), jnp.float32)
             / jnp.sqrt(3.0 * C),
    }


def _init_downsample(key, Cin, Cout):
    k1, k2, k3 = jax.random.split(key, 3)
    return {
        "lnw": 1.0 + 0.1 * jax.random.normal(k1, (1, Cin), jnp.float32),
        "lnb": 0.1 * jax.random.normal(k2, (1, Cin), jnp.float32),
        "w": jax.random.normal(k3, (4, Cin, Cout), jnp.float32)
             / jnp.sqrt(4.0 * Cin),
    }


def init_encoder_params(key, channels_list):
    params = {"down": [], "middle": None}
    for cin, cout in zip(channels_list[:-1], channels_list[1:]):
        key, kr, kd = jax.random.split(key, 3)
        params["down"].append({
            "res": _init_residual_stack(kr, cin, n_blocks=2),    # ResNetBlock
            "down": _init_downsample(kd, cin, cout),             # DownsampleBlock
        })
    key, km = jax.random.split(key)
    params["middle"] = _init_residual_stack(km, channels_list[-1], n_blocks=4)
    return params


# ---------------------------------------------------------------------------
# Full Encoder forward (Pallas path) — activations in (B, T, C)
# ---------------------------------------------------------------------------
def encoder_forward(x, params, compute_dtype=jnp.bfloat16):
    for level in params["down"]:
        x = down_block(x, level["res"], level["down"], compute_dtype)
    x = residual_chain(x, params["middle"], compute_dtype)
    return x


# ---------------------------------------------------------------------------
# Pure-JAX reference (mirrors the PyTorch module in NCT layout, f32)
# ---------------------------------------------------------------------------
def _ref_ln_lrelu_nct(x, lnw, lnb):
    mu = jnp.mean(x, axis=1, keepdims=True)
    var = jnp.mean((x - mu) ** 2, axis=1, keepdims=True)
    z = (x - mu) / jnp.sqrt(var + EPS)
    z = z * lnw.reshape(1, -1, 1) + lnb.reshape(1, -1, 1)
    return jnp.where(z >= 0, z, LEAK * z)


def _ref_conv_nct(x, w_kio, stride):
    w_oik = jnp.transpose(w_kio, (2, 1, 0))          # (Cout, Cin, K)
    return jax.lax.conv_general_dilated(
        x, w_oik, window_strides=(stride,), padding=[(1, 1)],
        dimension_numbers=("NCH", "OIH", "NCH"))


def ref_encoder_forward(x, params):
    def res_stack(x, p):
        for i in range(p["lnw"].shape[0]):
            z = _ref_ln_lrelu_nct(x, p["lnw"][i], p["lnb"][i])
            x = x + _ref_conv_nct(z, p["w"][i], 1)
        return x

    for level in params["down"]:
        x = res_stack(x, level["res"])
        dp = level["down"]
        z = _ref_ln_lrelu_nct(x, dp["lnw"].reshape(-1), dp["lnb"].reshape(-1))
        x = _ref_conv_nct(z, dp["w"], 2)
    x = res_stack(x, params["middle"])
    return x


# ---------------------------------------------------------------------------
if __name__ == "__main__":
    channels_list = [4, 8, 16]   # Encoder(channels_list)
    B, T = 2, 16                 # PyTorch input would be (B, C0, T) = (2, 4, 16)

    key_p, key_x = jax.random.split(jax.random.PRNGKey(0))
    params = init_encoder_params(key_p, channels_list)

    x_nct = jax.random.normal(key_x, (B, channels_list[0], T), jnp.float32)
    x_ntc = jnp.transpose(x_nct, (0, 2, 1))          # (B, T, C) kernel layout

    # Verification configuration: identical kernels, f32 matmul operands.
    fwd_f32 = jax.jit(functools.partial(encoder_forward, compute_dtype=jnp.float32))
    out_f32 = jax.block_until_ready(fwd_f32(x_ntc, params))

    # Performance configuration: bf16 MXU operands, f32 accumulation/LN/residual.
    fwd_bf16 = jax.jit(functools.partial(encoder_forward, compute_dtype=jnp.bfloat16))
    out_bf16 = jax.block_until_ready(fwd_bf16(x_ntc, params))

    ref_ntc = jnp.transpose(ref_encoder_forward(x_nct, params), (0, 2, 1))

    assert out_f32.shape == ref_ntc.shape == (B, T // 4, channels_list[-1]), out_f32.shape
    err_f32 = float(jnp.max(jnp.abs(out_f32 - ref_ntc)))
    assert err_f32 < 1e-3, err_f32

    out_bf16_f = out_bf16.astype(jnp.float32)
    assert bool(jnp.all(jnp.isfinite(out_bf16_f)))
    scale = float(jnp.max(jnp.abs(ref_ntc)))
    err_bf16 = float(jnp.max(jnp.abs(out_bf16_f - ref_ntc)))
    assert err_bf16 < max(0.25, 0.05 * scale), (err_bf16, scale)   # bf16-operand tolerance

    print("KERNEL_OK")
</pallas_src>

<mosaic_0001>
module attributes {stable_mosaic.version = 11 : i64} {
  func.func @_residual_chain_kernel(%arg0: i32, %arg1: memref<1x4x16xf32, #tpu.memory_space<vmem>>, %arg2: memref<4x16xf32, #tpu.memory_space<vmem>>, %arg3: memref<4x16xf32, #tpu.memory_space<vmem>>, %arg4: memref<12x16x16xf32, #tpu.memory_space<vmem>>, %arg5: memref<1x4x16xf32, #tpu.memory_space<vmem>>, %arg6: memref<13x16xf32, #tpu.memory_space<vmem>>) attributes {dimension_semantics = [#tpu.dimension_semantics<parallel>], iteration_bounds = array<i64: 2>, scalar_prefetch = 0 : i64, scratch_operands = 1 : i64, tpu.core_type = #tpu.core_type<tc>, window_params = [{transform_indices = @transform_0, window_bounds = array<i64: 1, 4, 16>}, {pipeline_mode = #tpu.pipeline_mode<synchronous>, transform_indices = @transform_1, window_bounds = array<i64: 4, 16>}, {pipeline_mode = #tpu.pipeline_mode<synchronous>, transform_indices = @transform_2, window_bounds = array<i64: 4, 16>}, {pipeline_mode = #tpu.pipeline_mode<synchronous>, transform_indices = @transform_3, window_bounds = array<i64: 12, 16, 16>}, {transform_indices = @transform_4, window_bounds = array<i64: 1, 4, 16>}]} {
    %c0 = arith.constant 0 : index
    %c0_0 = arith.constant 0 : index
    %c0_1 = arith.constant 0 : index
    %0 = vector.load %arg1[%c0, %c0_0, %c0_1] : memref<1x4x16xf32, #tpu.memory_space<vmem>>, vector<1x4x16xf32>
    %1 = vector.shape_cast %0 : vector<1x4x16xf32> to vector<4x16xf32>
    %cst = arith.constant 0.000000e+00 : f32
    %2 = vector.broadcast %cst : f32 to vector<1x16xf32>
    %c7 = arith.constant 7 : index
    %c0_2 = arith.constant 0 : index
    %3 = vector.load %arg6[%c7, %c0_2] : memref<13x16xf32, #tpu.memory_space<vmem>>, vector<1x16xf32>
    tpu.vector_store %arg6[%c7, %c0_2], %2 {strides = array<i32>} : memref<13x16xf32, #tpu.memory_space<vmem>>, vector<1x16xf32>,
    %c12 = arith.constant 12 : index
    %c0_3 = arith.constant 0 : index
    %4 = vector.load %arg6[%c12, %c0_3] : memref<13x16xf32, #tpu.memory_space<vmem>>, vector<1x16xf32>
    tpu.vector_store %arg6[%c12, %c0_3], %2 {strides = array<i32>} : memref<13x16xf32, #tpu.memory_space<vmem>>, vector<1x16xf32>,
    %c0_i32 = arith.constant 0 : i32
    %c4_i32 = arith.constant 4 : i32
    %5 = arith.addi %c0_i32, %c4_i32 : i32
    %c1_i32 = arith.constant 1 : i32
    %6 = scf.for %arg7 = %c0_i32 to %5 step %c1_i32 iter_args(%arg8 = %1) -> (vector<4x16xf32>)  : i32 {
      %10 = arith.index_cast %arg7 : i32 to index
      %c0_8 = arith.constant 0 : index
      %11 = vector.load %arg2[%10, %c0_8] : memref<4x16xf32, #tpu.memory_space<vmem>>, vector<1x16xf32>
      %12 = arith.index_cast %arg7 : i32 to index
      %c0_9 = arith.constant 0 : index
      %13 = vector.load %arg3[%12, %c0_9] : memref<4x16xf32, #tpu.memory_space<vmem>>, vector<1x16xf32>
      %cst_10 = arith.constant dense<0.000000e+00> : vector<4xf32>
      %14 = vector.multi_reduction <add>, %arg8, %cst_10 [1] : vector<4x16xf32> to vector<4xf32>
      %15 = vector.shape_cast %14 : vector<4xf32> to vector<4x1xf32>
      %cst_11 = arith.constant 1.600000e+01 : f32
      %16 = vector.broadcast %cst_11 : f32 to vector<4x1xf32>
      %17 = arith.divf %15, %16 : vector<4x1xf32>
      %18 = arith.mulf %arg8, %arg8 : vector<4x16xf32>
      %cst_12 = arith.constant dense<0.000000e+00> : vector<4xf32>
      %19 = vector.multi_reduction <add>, %18, %cst_12 [1] : vector<4x16xf32> to vector<4xf32>
      %20 = vector.shape_cast %19 : vector<4xf32> to vector<4x1xf32>
      %cst_13 = arith.constant 1.600000e+01 : f32
      %21 = vector.broadcast %cst_13 : f32 to vector<4x1xf32>
      %22 = arith.divf %20, %21 : vector<4x1xf32>
      %23 = arith.mulf %17, %17 : vector<4x1xf32>
      %24 = arith.subf %22, %23 : vector<4x1xf32>
      %cst_14 = arith.constant 0.000000e+00 : f32
      %25 = vector.broadcast %cst_14 : f32 to vector<4x1xf32>
      %26 = arith.maximumf %24, %25 : vector<4x1xf32>
      %27 = vector.broadcast %17 : vector<4x1xf32> to vector<4x16xf32>
      %28 = arith.subf %arg8, %27 : vector<4x16xf32>
      %cst_15 = arith.constant 9.99999974E-6 : f32
      %29 = vector.broadcast %cst_15 : f32 to vector<4x1xf32>
      %30 = arith.addf %26, %29 : vector<4x1xf32>
      %31 = math.rsqrt %30 : vector<4x1xf32>
      %32 = vector.broadcast %31 : vector<4x1xf32> to vector<4x16xf32>
      %33 = arith.mulf %28, %32 : vector<4x16xf32>
      %34 = vector.broadcast %11 : vector<1x16xf32> to vector<4x16xf32>
      %35 = arith.mulf %33, %34 : vector<4x16xf32>
      %36 = vector.broadcast %13 : vector<1x16xf32> to vector<4x16xf32>
      %37 = arith.addf %35, %36 : vector<4x16xf32>
      %cst_16 = arith.constant 0.000000e+00 : f32
      %38 = vector.broadcast %cst_16 : f32 to vector<4x16xf32>
      %39 = arith.cmpf oge, %37, %38 : vector<4x16xf32>
      %cst_17 = arith.constant 0.00999999977 : f32
      %40 = vector.broadcast %cst_17 : f32 to vector<4x16xf32>
      %41 = arith.mulf %40, %37 : vector<4x16xf32>
      %42 = arith.select %39, %37, %41 : vector<4x16xi1>, vector<4x16xf32>
      %c8 = arith.constant 8 : index
      %c0_18 = arith.constant 0 : index
      %43 = vector.load %arg6[%c8, %c0_18] : memref<13x16xf32, #tpu.memory_space<vmem>>, vector<4x16xf32>
      tpu.vector_store %arg6[%c8, %c0_18], %42 {strides = array<i32>} : memref<13x16xf32, #tpu.memory_space<vmem>>, vector<4x16xf32>,
      %c7_19 = arith.constant 7 : index
      %c0_20 = arith.constant 0 : index
      %44 = vector.load %arg6[%c7_19, %c0_20] : memref<13x16xf32, #tpu.memory_space<vmem>>, vector<4x16xf32>
      %c3_i32 = arith.constant 3 : i32
      %45 = arith.muli %arg7, %c3_i32 : i32
      %c0_i32_21 = arith.constant 0 : i32
      %46 = arith.addi %45, %c0_i32_21 : i32
      %47 = arith.index_cast %46 : i32 to index
      %c0_22 = arith.constant 0 : index
      %c0_23 = arith.constant 0 : index
      %48 = vector.load %arg4[%47, %c0_22, %c0_23] : memref<12x16x16xf32, #tpu.memory_space<vmem>>, vector<1x16x16xf32>
      %49 = vector.shape_cast %48 : vector<1x16x16xf32> to vector<16x16xf32>
      %cst_24 = arith.constant dense<0.000000e+00> : vector<4x16xf32>
      %50 = tpu.matmul %44, %49, %cst_24 {dimension_numbers = #tpu.dot_dimension_numbers<[1], [0], [0], [1], [0, 0, 1, 1], [], []>} : vector<4x16xf32>, vector<16x16xf32>, vector<4x16xf32> -> vector<4x16xf32>
      %51 = arith.addf %arg8, %50 : vector<4x16xf32>
      %c8_25 = arith.constant 8 : index
      %c0_26 = arith.constant 0 : index
      %52 = vector.load %arg6[%c8_25, %c0_26] : memref<13x16xf32, #tpu.memory_space<vmem>>, vector<4x16xf32>
      %c3_i32_27 = arith.constant 3 : i32
      %53 = arith.muli %arg7, %c3_i32_27 : i32
      %c1_i32_28 = arith.constant 1 : i32
      %54 = arith.addi %53, %c1_i32_28 : i32
      %55 = arith.index_cast %54 : i32 to index
      %c0_29 = arith.constant 0 : index
      %c0_30 = arith.constant 0 : index
      %56 = vector.load %arg4[%55, %c0_29, %c0_30] : memref<12x16x16xf32, #tpu.memory_space<vmem>>, vector<1x16x16xf32>
      %57 = vector.shape_cast %56 : vector<1x16x16xf32> to vector<16x16xf32>
      %cst_31 = arith.constant dense<0.000000e+00> : vector<4x16xf32>
      %58 = tpu.matmul %52, %57, %cst_31 {dimension_numbers = #tpu.dot_dimension_numbers<[1], [0], [0], [1], [0, 0, 1, 1], [], []>} : vector<4x16xf32>, vector<16x16xf32>, vector<4x16xf32> -> vector<4x16xf32>
      %59 = arith.addf %51, %58 : vector<4x16xf32>
      %c9 = arith.constant 9 : index
      %c0_32 = arith.constant 0 : index
      %60 = vector.load %arg6[%c9, %c0_32] : memref<13x16xf32, #tpu.memory_space<vmem>>, vector<4x16xf32>
      %c3_i32_33 = arith.constant 3 : i32
      %61 = arith.muli %arg7, %c3_i32_33 : i32
      %c2_i32 = arith.constant 2 : i32
      %62 = arith.addi %61, %c2_i32 : i32
      %63 = arith.index_cast %62 : i32 to index
      %c0_34 = arith.constant 0 : index
      %c0_35 = arith.constant 0 : index
      %64 = vector.load %arg4[%63, %c0_34, %c0_35] : memref<12x16x16xf32, #tpu.memory_space<vmem>>, vector<1x16x16xf32>
      %65 = vector.shape_cast %64 : vector<1x16x16xf32> to vector<16x16xf32>
      %cst_36 = arith.constant dense<0.000000e+00> : vector<4x16xf32>
      %66 = tpu.matmul %60, %65, %cst_36 {dimension_numbers = #tpu.dot_dimension_numbers<[1], [0], [0], [1], [0, 0, 1, 1], [], []>} : vector<4x16xf32>, vector<16x16xf32>, vector<4x16xf32> -> vector<4x16xf32>
      %67 = arith.addf %59, %66 : vector<4x16xf32>
      scf.yield %67 : vector<4x16xf32>
    }
    %c4_i32_4 = arith.constant 4 : i32
    %c0_5 = arith.constant 0 : index
    %c0_6 = arith.constant 0 : index
    %c0_7 = arith.constant 0 : index
    %7 = vector.load %arg5[%c0_5, %c0_6, %c0_7] : memref<1x4x16xf32, #tpu.memory_space<vmem>>, vector<1x4x16xf32>
    %8 = vector.shape_cast %7 : vector<1x4x16xf32> to vector<4x16xf32>
    %9 = vector.shape_cast %6 : vector<4x16xf32> to vector<1x4x16xf32>
    tpu.vector_store %arg5[%c0_5, %c0_6, %c0_7], %9 {strides = array<i32>} : memref<1x4x16xf32, #tpu.memory_space<vmem>>, vector<1x4x16xf32>,
    return
  }
  func.func @transform_0(%arg0: i32) -> (i32, i32, i32) {
    %c0_i32 = arith.constant 0 : i32
    %c0_i32_0 = arith.constant 0 : i32
    %c0_i32_1 = arith.constant 0 : i32
    return %arg0, %c0_i32, %c0_i32_0 : i32, i32, i32
  }
  func.func @transform_1(%arg0: i32) -> (i32, i32) {
    %c0_i32 = arith.constant 0 : i32
    %c0_i32_0 = arith.constant 0 : i32
    %c0_i32_1 = arith.constant 0 : i32
    return %c0_i32, %c0_i32_0 : i32, i32
  }
  func.func @transform_2(%arg0: i32) -> (i32, i32) {
    %c0_i32 = arith.constant 0 : i32
    %c0_i32_0 = arith.constant 0 : i32
    %c0_i32_1 = arith.constant 0 : i32
    return %c0_i32, %c0_i32_0 : i32, i32
  }
  func.func @transform_3(%arg0: i32) -> (i32, i32, i32) {
    %c0_i32 = arith.constant 0 : i32
    %c0_i32_0 = arith.constant 0 : i32
    %c0_i32_1 = arith.constant 0 : i32
    %c0_i32_2 = arith.constant 0 : i32
    return %c0_i32, %c0_i32_0, %c0_i32_1 : i32, i32, i32
  }
  func.func @transform_4(%arg0: i32) -> (i32, i32, i32) {
    %c0_i32 = arith.constant 0 : i32
    %c0_i32_0 = arith.constant 0 : i32
    %c0_i32_1 = arith.constant 0 : i32
    return %arg0, %c0_i32, %c0_i32_0 : i32, i32, i32
  }
}

module attributes {stable_mosaic.version = 11 : i64} {
  func.func @_down_block_kernel(%arg0: i32, %arg1: memref<1x8x8xf32, #tpu.memory_space<vmem>>, %arg2: memref<2x8xf32, #tpu.memory_space<vmem>>, %arg3: memref<2x8xf32, #tpu.memory_space<vmem>>, %arg4: memref<6x8x8xf32, #tpu.memory_space<vmem>>, %arg5: memref<1x8xf32, #tpu.memory_space<vmem>>, %arg6: memref<1x8xf32, #tpu.memory_space<vmem>>, %arg7: memref<4x8x16xf32, #tpu.memory_space<vmem>>, %arg8: memref<1x4x16xf32, #tpu.memory_space<vmem>>, %arg9: memref<17x8xf32, #tpu.memory_space<vmem>>) attributes {dimension_semantics = [#tpu.dimension_semantics<parallel>], iteration_bounds = array<i64: 2>, scalar_prefetch = 0 : i64, scratch_operands = 1 : i64, tpu.core_type = #tpu.core_type<tc>, window_params = [{transform_indices = @transform_0, window_bounds = array<i64: 1, 8, 8>}, {pipeline_mode = #tpu.pipeline_mode<synchronous>, transform_indices = @transform_1, window_bounds = array<i64: 2, 8>}, {pipeline_mode = #tpu.pipeline_mode<synchronous>, transform_indices = @transform_2, window_bounds = array<i64: 2, 8>}, {pipeline_mode = #tpu.pipeline_mode<synchronous>, transform_indices = @transform_3, window_bounds = array<i64: 6, 8, 8>}, {pipeline_mode = #tpu.pipeline_mode<synchronous>, transform_indices = @transform_4, window_bounds = array<i64: 1, 8>}, {pipeline_mode = #tpu.pipeline_mode<synchronous>, transform_indices = @transform_5, window_bounds = array<i64: 1, 8>}, {pipeline_mode = #tpu.pipeline_mode<synchronous>, transform_indices = @transform_6, window_bounds = array<i64: 4, 8, 16>}, {transform_indices = @transform_7, window_bounds = array<i64: 1, 4, 16>}]} {
    %c0 = arith.constant 0 : index
    %c0_0 = arith.constant 0 : index
    %c0_1 = arith.constant 0 : index
    %0 = vector.load %arg1[%c0, %c0_0, %c0_1] : memref<1x8x8xf32, #tpu.memory_space<vmem>>, vector<1x8x8xf32>
    %1 = vector.shape_cast %0 : vector<1x8x8xf32> to vector<8x8xf32>
    %cst = arith.constant 0.000000e+00 : f32
    %2 = vector.broadcast %cst : f32 to vector<1x8xf32>
    %c7 = arith.constant 7 : index
    %c0_2 = arith.constant 0 : index
    %3 = vector.load %arg9[%c7, %c0_2] : memref<17x8xf32, #tpu.memory_space<vmem>>, vector<1x8xf32>
    tpu.vector_store %arg9[%c7, %c0_2], %2 {strides = array<i32>} : memref<17x8xf32, #tpu.memory_space<vmem>>, vector<1x8xf32>,
    %c16 = arith.constant 16 : index
    %c0_3 = arith.constant 0 : index
    %4 = vector.load %arg9[%c16, %c0_3] : memref<17x8xf32, #tpu.memory_space<vmem>>, vector<1x8xf32>
    tpu.vector_store %arg9[%c16, %c0_3], %2 {strides = array<i32>} : memref<17x8xf32, #tpu.memory_space<vmem>>, vector<1x8xf32>,
    %c0_i32 = arith.constant 0 : i32
    %c2_i32 = arith.constant 2 : i32
    %5 = arith.addi %c0_i32, %c2_i32 : i32
    %c1_i32 = arith.constant 1 : i32
    %6 = scf.for %arg10 = %c0_i32 to %5 step %c1_i32 iter_args(%arg11 = %1) -> (vector<8x8xf32>)  : i32 {
      %61 = arith.index_cast %arg10 : i32 to index
      %c0_40 = arith.constant 0 : index
      %62 = vector.load %arg2[%61, %c0_40] : memref<2x8xf32, #tpu.memory_space<vmem>>, vector<1x8xf32>
      %63 = arith.index_cast %arg10 : i32 to index
      %c0_41 = arith.constant 0 : index
      %64 = vector.load %arg3[%63, %c0_41] : memref<2x8xf32, #tpu.memory_space<vmem>>, vector<1x8xf32>
      %cst_42 = arith.constant dense<0.000000e+00> : vector<8xf32>
      %65 = vector.multi_reduction <add>, %arg11, %cst_42 [1] : vector<8x8xf32> to vector<8xf32>
      %66 = vector.shape_cast %65 : vector<8xf32> to vector<8x1xf32>
      %cst_43 = arith.constant 8.000000e+00 : f32
      %67 = vector.broadcast %cst_43 : f32 to vector<8x1xf32>
      %68 = arith.divf %66, %67 : vector<8x1xf32>
      %69 = arith.mulf %arg11, %arg11 : vector<8x8xf32>
      %cst_44 = arith.constant dense<0.000000e+00> : vector<8xf32>
      %70 = vector.multi_reduction <add>, %69, %cst_44 [1] : vector<8x8xf32> to vector<8xf32>
      %71 = vector.shape_cast %70 : vector<8xf32> to vector<8x1xf32>
      %cst_45 = arith.constant 8.000000e+00 : f32
      %72 = vector.broadcast %cst_45 : f32 to vector<8x1xf32>
      %73 = arith.divf %71, %72 : vector<8x1xf32>
      %74 = arith.mulf %68, %68 : vector<8x1xf32>
      %75 = arith.subf %73, %74 : vector<8x1xf32>
      %cst_46 = arith.constant 0.000000e+00 : f32
      %76 = vector.broadcast %cst_46 : f32 to vector<8x1xf32>
      %77 = arith.maximumf %75, %76 : vector<8x1xf32>
      %78 = vector.broadcast %68 : vector<8x1xf32> to vector<8x8xf32>
      %79 = arith.subf %arg11, %78 : vector<8x8xf32>
      %cst_47 = arith.constant 9.99999974E-6 : f32
      %80 = vector.broadcast %cst_47 : f32 to vector<8x1xf32>
      %81 = arith.addf %77, %80 : vector<8x1xf32>
      %82 = math.rsqrt %81 : vector<8x1xf32>
      %83 = vector.broadcast %82 : vector<8x1xf32> to vector<8x8xf32>
      %84 = arith.mulf %79, %83 : vector<8x8xf32>
      %85 = vector.broadcast %62 : vector<1x8xf32> to vector<8x8xf32>
      %86 = arith.mulf %84, %85 : vector<8x8xf32>
      %87 = vector.broadcast %64 : vector<1x8xf32> to vector<8x8xf32>
      %88 = arith.addf %86, %87 : vector<8x8xf32>
      %cst_48 = arith.constant 0.000000e+00 : f32
      %89 = vector.broadcast %cst_48 : f32 to vector<8x8xf32>
      %90 = arith.cmpf oge, %88, %89 : vector<8x8xf32>
      %cst_49 = arith.constant 0.00999999977 : f32
      %91 = vector.broadcast %cst_49 : f32 to vector<8x8xf32>
      %92 = arith.mulf %91, %88 : vector<8x8xf32>
      %93 = arith.select %90, %88, %92 : vector<8x8xi1>, vector<8x8xf32>
      %c8_50 = arith.constant 8 : index
      %c0_51 = arith.constant 0 : index
      %94 = vector.load %arg9[%c8_50, %c0_51] : memref<17x8xf32, #tpu.memory_space<vmem>>, vector<8x8xf32>
      tpu.vector_store %arg9[%c8_50, %c0_51], %93 {strides = array<i32>} : memref<17x8xf32, #tpu.memory_space<vmem>>, vector<8x8xf32>,
      %c7_52 = arith.constant 7 : index
      %c0_53 = arith.constant 0 : index
      %95 = vector.load %arg9[%c7_52, %c0_53] : memref<17x8xf32, #tpu.memory_space<vmem>>, vector<8x8xf32>
      %c3_i32 = arith.constant 3 : i32
      %96 = arith.muli %arg10, %c3_i32 : i32
      %c0_i32_54 = arith.constant 0 : i32
      %97 = arith.addi %96, %c0_i32_54 : i32
      %98 = arith.index_cast %97 : i32 to index
      %c0_55 = arith.constant 0 : index
      %c0_56 = arith.constant 0 : index
      %99 = vector.load %arg4[%98, %c0_55, %c0_56] : memref<6x8x8xf32, #tpu.memory_space<vmem>>, vector<1x8x8xf32>
      %100 = vector.shape_cast %99 : vector<1x8x8xf32> to vector<8x8xf32>
      %cst_57 = arith.constant dense<0.000000e+00> : vector<8x8xf32>
      %101 = tpu.matmul %95, %100, %cst_57 {dimension_numbers = #tpu.dot_dimension_numbers<[1], [0], [0], [1], [0, 0, 1, 1], [], []>} : vector<8x8xf32>, vector<8x8xf32>, vector<8x8xf32> -> vector<8x8xf32>
      %102 = arith.addf %arg11, %101 : vector<8x8xf32>
      %c8_58 = arith.constant 8 : index
      %c0_59 = arith.constant 0 : index
      %103 = vector.load %arg9[%c8_58, %c0_59] : memref<17x8xf32, #tpu.memory_space<vmem>>, vector<8x8xf32>
      %c3_i32_60 = arith.constant 3 : i32
      %104 = arith.muli %arg10, %c3_i32_60 : i32
      %c1_i32_61 = arith.constant 1 : i32
      %105 = arith.addi %104, %c1_i32_61 : i32
      %106 = arith.index_cast %105 : i32 to index
      %c0_62 = arith.constant 0 : index
      %c0_63 = arith.constant 0 : index
      %107 = vector.load %arg4[%106, %c0_62, %c0_63] : memref<6x8x8xf32, #tpu.memory_space<vmem>>, vector<1x8x8xf32>
      %108 = vector.shape_cast %107 : vector<1x8x8xf32> to vector<8x8xf32>
      %cst_64 = arith.constant dense<0.000000e+00> : vector<8x8xf32>
      %109 = tpu.matmul %103, %108, %cst_64 {dimension_numbers = #tpu.dot_dimension_numbers<[1], [0], [0], [1], [0, 0, 1, 1], [], []>} : vector<8x8xf32>, vector<8x8xf32>, vector<8x8xf32> -> vector<8x8xf32>
      %110 = arith.addf %102, %109 : vector<8x8xf32>
      %c9_65 = arith.constant 9 : index
      %c0_66 = arith.constant 0 : index
      %111 = vector.load %arg9[%c9_65, %c0_66] : memref<17x8xf32, #tpu.memory_space<vmem>>, vector<8x8xf32>
      %c3_i32_67 = arith.constant 3 : i32
      %112 = arith.muli %arg10, %c3_i32_67 : i32
      %c2_i32_68 = arith.constant 2 : i32
      %113 = arith.addi %112, %c2_i32_68 : i32
      %114 = arith.index_cast %113 : i32 to index
      %c0_69 = arith.constant 0 : index
      %c0_70 = arith.constant 0 : index
      %115 = vector.load %arg4[%114, %c0_69, %c0_70] : memref<6x8x8xf32, #tpu.memory_space<vmem>>, vector<1x8x8xf32>
      %116 = vector.shape_cast %115 : vector<1x8x8xf32> to vector<8x8xf32>
      %cst_71 = arith.constant dense<0.000000e+00> : vector<8x8xf32>
      %117 = tpu.matmul %111, %116, %cst_71 {dimension_numbers = #tpu.dot_dimension_numbers<[1], [0], [0], [1], [0, 0, 1, 1], [], []>} : vector<8x8xf32>, vector<8x8xf32>, vector<8x8xf32> -> vector<8x8xf32>
      %118 = arith.addf %110, %117 : vector<8x8xf32>
      scf.yield %118 : vector<8x8xf32>
    }
    %c2_i32_4 = arith.constant 2 : i32
    %c0_5 = arith.constant 0 : index
    %c0_6 = arith.constant 0 : index
    %7 = vector.load %arg5[%c0_5, %c0_6] : memref<1x8xf32, #tpu.memory_space<vmem>>, vector<1x8xf32>
    %c0_7 = arith.constant 0 : index
    %c0_8 = arith.constant 0 : index
    %8 = vector.load %arg6[%c0_7, %c0_8] : memref<1x8xf32, #tpu.memory_space<vmem>>, vector<1x8xf32>
    %cst_9 = arith.constant dense<0.000000e+00> : vector<8xf32>
    %9 = vector.multi_reduction <add>, %6, %cst_9 [1] : vector<8x8xf32> to vector<8xf32>
    %10 = vector.shape_cast %9 : vector<8xf32> to vector<8x1xf32>
    %cst_10 = arith.constant 8.000000e+00 : f32
    %11 = vector.broadcast %cst_10 : f32 to vector<8x1xf32>
    %12 = arith.divf %10, %11 : vector<8x1xf32>
    %13 = arith.mulf %6, %6 : vector<8x8xf32>
    %cst_11 = arith.constant dense<0.000000e+00> : vector<8xf32>
    %14 = vector.multi_reduction <add>, %13, %cst_11 [1] : vector<8x8xf32> to vector<8xf32>
    %15 = vector.shape_cast %14 : vector<8xf32> to vector<8x1xf32>
    %cst_12 = arith.constant 8.000000e+00 : f32
    %16 = vector.broadcast %cst_12 : f32 to vector<8x1xf32>
    %17 = arith.divf %15, %16 : vector<8x1xf32>
    %18 = arith.mulf %12, %12 : vector<8x1xf32>
    %19 = arith.subf %17, %18 : vector<8x1xf32>
    %cst_13 = arith.constant 0.000000e+00 : f32
    %20 = vector.broadcast %cst_13 : f32 to vector<8x1xf32>
    %21 = arith.maximumf %19, %20 : vector<8x1xf32>
    %22 = vector.broadcast %12 : vector<8x1xf32> to vector<8x8xf32>
    %23 = arith.subf %6, %22 : vector<8x8xf32>
    %cst_14 = arith.constant 9.99999974E-6 : f32
    %24 = vector.broadcast %cst_14 : f32 to vector<8x1xf32>
    %25 = arith.addf %21, %24 : vector<8x1xf32>
    %26 = math.rsqrt %25 : vector<8x1xf32>
    %27 = vector.broadcast %26 : vector<8x1xf32> to vector<8x8xf32>
    %28 = arith.mulf %23, %27 : vector<8x8xf32>
    %29 = vector.broadcast %7 : vector<1x8xf32> to vector<8x8xf32>
    %30 = arith.mulf %28, %29 : vector<8x8xf32>
    %31 = vector.broadcast %8 : vector<1x8xf32> to vector<8x8xf32>
    %32 = arith.addf %30, %31 : vector<8x8xf32>
    %cst_15 = arith.constant 0.000000e+00 : f32
    %33 = vector.broadcast %cst_15 : f32 to vector<8x8xf32>
    %34 = arith.cmpf oge, %32, %33 : vector<8x8xf32>
    %cst_16 = arith.constant 0.00999999977 : f32
    %35 = vector.broadcast %cst_16 : f32 to vector<8x8xf32>
    %36 = arith.mulf %35, %32 : vector<8x8xf32>
    %37 = arith.select %34, %32, %36 : vector<8x8xi1>, vector<8x8xf32>
    %c8 = arith.constant 8 : index
    %c0_17 = arith.constant 0 : index
    %38 = vector.load %arg9[%c8, %c0_17] : memref<17x8xf32, #tpu.memory_space<vmem>>, vector<8x8xf32>
    tpu.vector_store %arg9[%c8, %c0_17], %37 {strides = array<i32>} : memref<17x8xf32, #tpu.memory_space<vmem>>, vector<8x8xf32>,
    %c8_18 = arith.constant 8 : index
    %c0_19 = arith.constant 0 : index
    %39 = tpu.strided_load %arg9[%c8_18, %c0_19] {strides = array<i32: 2, 1>} : memref<17x8xf32, #tpu.memory_space<vmem>>, vector<4x8xf32>
    %c1 = arith.constant 1 : index
    %c0_20 = arith.constant 0 : index
    %c0_21 = arith.constant 0 : index
    %40 = vector.load %arg7[%c1, %c0_20, %c0_21] : memref<4x8x16xf32, #tpu.memory_space<vmem>>, vector<1x8x16xf32>
    %41 = vector.shape_cast %40 : vector<1x8x16xf32> to vector<8x16xf32>
    %cst_22 = arith.constant dense<0.000000e+00> : vector<4x16xf32>
    %42 = tpu.matmul %39, %41, %cst_22 {dimension_numbers = #tpu.dot_dimension_numbers<[1], [0], [0], [1], [0, 0, 1, 1], [], []>} : vector<4x8xf32>, vector<8x16xf32>, vector<4x16xf32> -> vector<4x16xf32>
    %c7_23 = arith.constant 7 : index
    %c0_24 = arith.constant 0 : index
    %43 = tpu.strided_load %arg9[%c7_23, %c0_24] {strides = array<i32: 2, 1>} : memref<17x8xf32, #tpu.memory_space<vmem>>, vector<4x8xf32>
    %c0_25 = arith.constant 0 : index
    %c0_26 = arith.constant 0 : index
    %c0_27 = arith.constant 0 : index
    %44 = vector.load %arg7[%c0_25, %c0_26, %c0_27] : memref<4x8x16xf32, #tpu.memory_space<vmem>>, vector<1x8x16xf32>
    %45 = vector.shape_cast %44 : vector<1x8x16xf32> to vector<8x16xf32>
    %cst_28 = arith.constant dense<0.000000e+00> : vector<4x16xf32>
    %46 = tpu.matmul %43, %45, %cst_28 {dimension_numbers = #tpu.dot_dimension_numbers<[1], [0], [0], [1], [0, 0, 1, 1], [], []>} : vector<4x8xf32>, vector<8x16xf32>, vector<4x16xf32> -> vector<4x16xf32>
    %47 = arith.addf %42, %46 : vector<4x16xf32>
    %c9 = arith.constant 9 : index
    %c0_29 = arith.constant 0 : index
    %48 = tpu.strided_load %arg9[%c9, %c0_29] {strides = array<i32: 2, 1>} : memref<17x8xf32, #tpu.memory_space<vmem>>, vector<4x8xf32>
    %c2 = arith.constant 2 : index
    %c0_30 = arith.constant 0 : index
    %c0_31 = arith.constant 0 : index
    %49 = vector.load %arg7[%c2, %c0_30, %c0_31] : memref<4x8x16xf32, #tpu.memory_space<vmem>>, vector<1x8x16xf32>
    %50 = vector.shape_cast %49 : vector<1x8x16xf32> to vector<8x16xf32>
    %cst_32 = arith.constant dense<0.000000e+00> : vector<4x16xf32>
    %51 = tpu.matmul %48, %50, %cst_32 {dimension_numbers = #tpu.dot_dimension_numbers<[1], [0], [0], [1], [0, 0, 1, 1], [], []>} : vector<4x8xf32>, vector<8x16xf32>, vector<4x16xf32> -> vector<4x16xf32>
    %52 = arith.addf %47, %51 : vector<4x16xf32>
    %c10 = arith.constant 10 : index
    %c0_33 = arith.constant 0 : index
    %53 = tpu.strided_load %arg9[%c10, %c0_33] {strides = array<i32: 2, 1>} : memref<17x8xf32, #tpu.memory_space<vmem>>, vector<4x8xf32>
    %c3 = arith.constant 3 : index
    %c0_34 = arith.constant 0 : index
    %c0_35 = arith.constant 0 : index
    %54 = vector.load %arg7[%c3, %c0_34, %c0_35] : memref<4x8x16xf32, #tpu.memory_space<vmem>>, vector<1x8x16xf32>
    %55 = vector.shape_cast %54 : vector<1x8x16xf32> to vector<8x16xf32>
    %cst_36 = arith.constant dense<0.000000e+00> : vector<4x16xf32>
    %56 = tpu.matmul %53, %55, %cst_36 {dimension_numbers = #tpu.dot_dimension_numbers<[1], [0], [0], [1], [0, 0, 1, 1], [], []>} : vector<4x8xf32>, vector<8x16xf32>, vector<4x16xf32> -> vector<4x16xf32>
    %57 = arith.addf %52, %56 : vector<4x16xf32>
    %c0_37 = arith.constant 0 : index
    %c0_38 = arith.constant 0 : index
    %c0_39 = arith.constant 0 : index
    %58 = vector.load %arg8[%c0_37, %c0_38, %c0_39] : memref<1x4x16xf32, #tpu.memory_space<vmem>>, vector<1x4x16xf32>
    %59 = vector.shape_cast %58 : vector<1x4x16xf32> to vector<4x16xf32>
    %60 = vector.shape_cast %57 : vector<4x16xf32> to vector<1x4x16xf32>
    tpu.vector_store %arg8[%c0_37, %c0_38, %c0_39], %60 {strides = array<i32>} : memref<1x4x16xf32, #tpu.memory_space<vmem>>, vector<1x4x16xf32>,
    return
  }
  func.func @transform_0(%arg0: i32) -> (i32, i32, i32) {
    %c0_i32 = arith.constant 0 : i32
    %c0_i32_0 = arith.constant 0 : i32
    %c0_i32_1 = arith.constant 0 : i32
    return %arg0, %c0_i32, %c0_i32_0 : i32, i32, i32
  }
  func.func @transform_1(%arg0: i32) -> (i32, i32) {
    %c0_i32 = arith.constant 0 : i32
    %c0_i32_0 = arith.constant 0 : i32
    %c0_i32_1 = arith.constant 0 : i32
    return %c0_i32, %c0_i32_0 : i32, i32
  }
  func.func @transform_2(%arg0: i32) -> (i32, i32) {
    %c0_i32 = arith.constant 0 : i32
    %c0_i32_0 = arith.constant 0 : i32
    %c0_i32_1 = arith.constant 0 : i32
    return %c0_i32, %c0_i32_0 : i32, i32
  }
  func.func @transform_3(%arg0: i32) -> (i32, i32, i32) {
    %c0_i32 = arith.constant 0 : i32
    %c0_i32_0 = arith.constant 0 : i32
    %c0_i32_1 = arith.constant 0 : i32
    %c0_i32_2 = arith.constant 0 : i32
    return %c0_i32, %c0_i32_0, %c0_i32_1 : i32, i32, i32
  }
  func.func @transform_4(%arg0: i32) -> (i32, i32) {
    %c0_i32 = arith.constant 0 : i32
    %c0_i32_0 = arith.constant 0 : i32
    %c0_i32_1 = arith.constant 0 : i32
    return %c0_i32, %c0_i32_0 : i32, i32
  }
  func.func @transform_5(%arg0: i32) -> (i32, i32) {
    %c0_i32 = arith.constant 0 : i32
    %c0_i32_0 = arith.constant 0 : i32
    %c0_i32_1 = arith.constant 0 : i32
    return %c0_i32, %c0_i32_0 : i32, i32
  }
  func.func @transform_6(%arg0: i32) -> (i32, i32, i32) {
    %c0_i32 = arith.constant 0 : i32
    %c0_i32_0 = arith.constant 0 : i32
    %c0_i32_1 = arith.constant 0 : i32
    %c0_i32_2 = arith.constant 0 : i32
    return %c0_i32, %c0_i32_0, %c0_i32_1 : i32, i32, i32
  }
  func.func @transform_7(%arg0: i32) -> (i32, i32, i32) {
    %c0_i32 = arith.constant 0 : i32
    %c0_i32_0 = arith.constant 0 : i32
    %c0_i32_1 = arith.constant 0 : i32
    return %arg0, %c0_i32, %c0_i32_0 : i32, i32, i32
  }
}

module attributes {stable_mosaic.version = 11 : i64} {
  func.func @_down_block_kernel(%arg0: i32, %arg1: memref<1x16x4xf32, #tpu.memory_space<vmem>>, %arg2: memref<2x4xf32, #tpu.memory_space<vmem>>, %arg3: memref<2x4xf32, #tpu.memory_space<vmem>>, %arg4: memref<6x4x4xf32, #tpu.memory_space<vmem>>, %arg5: memref<1x4xf32, #tpu.memory_space<vmem>>, %arg6: memref<1x4xf32, #tpu.memory_space<vmem>>, %arg7: memref<4x4x8xf32, #tpu.memory_space<vmem>>, %arg8: memref<1x8x8xf32, #tpu.memory_space<vmem>>, %arg9: memref<25x4xf32, #tpu.memory_space<vmem>>) attributes {dimension_semantics = [#tpu.dimension_semantics<parallel>], iteration_bounds = array<i64: 2>, scalar_prefetch = 0 : i64, scratch_operands = 1 : i64, tpu.core_type = #tpu.core_type<tc>, window_params = [{transform_indices = @transform_0, window_bounds = array<i64: 1, 16, 4>}, {pipeline_mode = #tpu.pipeline_mode<synchronous>, transform_indices = @transform_1, window_bounds = array<i64: 2, 4>}, {pipeline_mode = #tpu.pipeline_mode<synchronous>, transform_indices = @transform_2, window_bounds = array<i64: 2, 4>}, {pipeline_mode = #tpu.pipeline_mode<synchronous>, transform_indices = @transform_3, window_bounds = array<i64: 6, 4, 4>}, {pipeline_mode = #tpu.pipeline_mode<synchronous>, transform_indices = @transform_4, window_bounds = array<i64: 1, 4>}, {pipeline_mode = #tpu.pipeline_mode<synchronous>, transform_indices = @transform_5, window_bounds = array<i64: 1, 4>}, {pipeline_mode = #tpu.pipeline_mode<synchronous>, transform_indices = @transform_6, window_bounds = array<i64: 4, 4, 8>}, {transform_indices = @transform_7, window_bounds = array<i64: 1, 8, 8>}]} {
    %c0 = arith.constant 0 : index
    %c0_0 = arith.constant 0 : index
    %c0_1 = arith.constant 0 : index
    %0 = vector.load %arg1[%c0, %c0_0, %c0_1] : memref<1x16x4xf32, #tpu.memory_space<vmem>>, vector<1x16x4xf32>
    %1 = vector.shape_cast %0 : vector<1x16x4xf32> to vector<16x4xf32>
    %cst = arith.constant 0.000000e+00 : f32
    %2 = vector.broadcast %cst : f32 to vector<1x4xf32>
    %c7 = arith.constant 7 : index
    %c0_2 = arith.constant 0 : index
    %3 = vector.load %arg9[%c7, %c0_2] : memref<25x4xf32, #tpu.memory_space<vmem>>, vector<1x4xf32>
    tpu.vector_store %arg9[%c7, %c0_2], %2 {strides = array<i32>} : memref<25x4xf32, #tpu.memory_space<vmem>>, vector<1x4xf32>,
    %c24 = arith.constant 24 : index
    %c0_3 = arith.constant 0 : index
    %4 = vector.load %arg9[%c24, %c0_3] : memref<25x4xf32, #tpu.memory_space<vmem>>, vector<1x4xf32>
    tpu.vector_store %arg9[%c24, %c0_3], %2 {strides = array<i32>} : memref<25x4xf32, #tpu.memory_space<vmem>>, vector<1x4xf32>,
    %c0_i32 = arith.constant 0 : i32
    %c2_i32 = arith.constant 2 : i32
    %5 = arith.addi %c0_i32, %c2_i32 : i32
    %c1_i32 = arith.constant 1 : i32
    %6 = scf.for %arg10 = %c0_i32 to %5 step %c1_i32 iter_args(%arg11 = %1) -> (vector<16x4xf32>)  : i32 {
      %61 = arith.index_cast %arg10 : i32 to index
      %c0_40 = arith.constant 0 : index
      %62 = vector.load %arg2[%61, %c0_40] : memref<2x4xf32, #tpu.memory_space<vmem>>, vector<1x4xf32>
      %63 = arith.index_cast %arg10 : i32 to index
      %c0_41 = arith.constant 0 : index
      %64 = vector.load %arg3[%63, %c0_41] : memref<2x4xf32, #tpu.memory_space<vmem>>, vector<1x4xf32>
      %cst_42 = arith.constant dense<0.000000e+00> : vector<16xf32>
      %65 = vector.multi_reduction <add>, %arg11, %cst_42 [1] : vector<16x4xf32> to vector<16xf32>
      %66 = vector.shape_cast %65 : vector<16xf32> to vector<16x1xf32>
      %cst_43 = arith.constant 4.000000e+00 : f32
      %67 = vector.broadcast %cst_43 : f32 to vector<16x1xf32>
      %68 = arith.divf %66, %67 : vector<16x1xf32>
      %69 = arith.mulf %arg11, %arg11 : vector<16x4xf32>
      %cst_44 = arith.constant dense<0.000000e+00> : vector<16xf32>
      %70 = vector.multi_reduction <add>, %69, %cst_44 [1] : vector<16x4xf32> to vector<16xf32>
      %71 = vector.shape_cast %70 : vector<16xf32> to vector<16x1xf32>
      %cst_45 = arith.constant 4.000000e+00 : f32
      %72 = vector.broadcast %cst_45 : f32 to vector<16x1xf32>
      %73 = arith.divf %71, %72 : vector<16x1xf32>
      %74 = arith.mulf %68, %68 : vector<16x1xf32>
      %75 = arith.subf %73, %74 : vector<16x1xf32>
      %cst_46 = arith.constant 0.000000e+00 : f32
      %76 = vector.broadcast %cst_46 : f32 to vector<16x1xf32>
      %77 = arith.maximumf %75, %76 : vector<16x1xf32>
      %78 = vector.broadcast %68 : vector<16x1xf32> to vector<16x4xf32>
      %79 = arith.subf %arg11, %78 : vector<16x4xf32>
      %cst_47 = arith.constant 9.99999974E-6 : f32
      %80 = vector.broadcast %cst_47 : f32 to vector<16x1xf32>
      %81 = arith.addf %77, %80 : vector<16x1xf32>
      %82 = math.rsqrt %81 : vector<16x1xf32>
      %83 = vector.broadcast %82 : vector<16x1xf32> to vector<16x4xf32>
      %84 = arith.mulf %79, %83 : vector<16x4xf32>
      %85 = vector.broadcast %62 : vector<1x4xf32> to vector<16x4xf32>
      %86 = arith.mulf %84, %85 : vector<16x4xf32>
      %87 = vector.broadcast %64 : vector<1x4xf32> to vector<16x4xf32>
      %88 = arith.addf %86, %87 : vector<16x4xf32>
      %cst_48 = arith.constant 0.000000e+00 : f32
      %89 = vector.broadcast %cst_48 : f32 to vector<16x4xf32>
      %90 = arith.cmpf oge, %88, %89 : vector<16x4xf32>
      %cst_49 = arith.constant 0.00999999977 : f32
      %91 = vector.broadcast %cst_49 : f32 to vector<16x4xf32>
      %92 = arith.mulf %91, %88 : vector<16x4xf32>
      %93 = arith.select %90, %88, %92 : vector<16x4xi1>, vector<16x4xf32>
      %c8_50 = arith.constant 8 : index
      %c0_51 = arith.constant 0 : index
      %94 = vector.load %arg9[%c8_50, %c0_51] : memref<25x4xf32, #tpu.memory_space<vmem>>, vector<16x4xf32>
      tpu.vector_store %arg9[%c8_50, %c0_51], %93 {strides = array<i32>} : memref<25x4xf32, #tpu.memory_space<vmem>>, vector<16x4xf32>,
      %c7_52 = arith.constant 7 : index
      %c0_53 = arith.constant 0 : index
      %95 = vector.load %arg9[%c7_52, %c0_53] : memref<25x4xf32, #tpu.memory_space<vmem>>, vector<16x4xf32>
      %c3_i32 = arith.constant 3 : i32
      %96 = arith.muli %arg10, %c3_i32 : i32
      %c0_i32_54 = arith.constant 0 : i32
      %97 = arith.addi %96, %c0_i32_54 : i32
      %98 = arith.index_cast %97 : i32 to index
      %c0_55 = arith.constant 0 : index
      %c0_56 = arith.constant 0 : index
      %99 = vector.load %arg4[%98, %c0_55, %c0_56] : memref<6x4x4xf32, #tpu.memory_space<vmem>>, vector<1x4x4xf32>
      %100 = vector.shape_cast %99 : vector<1x4x4xf32> to vector<4x4xf32>
      %cst_57 = arith.constant dense<0.000000e+00> : vector<16x4xf32>
      %101 = tpu.matmul %95, %100, %cst_57 {dimension_numbers = #tpu.dot_dimension_numbers<[1], [0], [0], [1], [0, 0, 1, 1], [], []>} : vector<16x4xf32>, vector<4x4xf32>, vector<16x4xf32> -> vector<16x4xf32>
      %102 = arith.addf %arg11, %101 : vector<16x4xf32>
      %c8_58 = arith.constant 8 : index
      %c0_59 = arith.constant 0 : index
      %103 = vector.load %arg9[%c8_58, %c0_59] : memref<25x4xf32, #tpu.memory_space<vmem>>, vector<16x4xf32>
      %c3_i32_60 = arith.constant 3 : i32
      %104 = arith.muli %arg10, %c3_i32_60 : i32
      %c1_i32_61 = arith.constant 1 : i32
      %105 = arith.addi %104, %c1_i32_61 : i32
      %106 = arith.index_cast %105 : i32 to index
      %c0_62 = arith.constant 0 : index
      %c0_63 = arith.constant 0 : index
      %107 = vector.load %arg4[%106, %c0_62, %c0_63] : memref<6x4x4xf32, #tpu.memory_space<vmem>>, vector<1x4x4xf32>
      %108 = vector.shape_cast %107 : vector<1x4x4xf32> to vector<4x4xf32>
      %cst_64 = arith.constant dense<0.000000e+00> : vector<16x4xf32>
      %109 = tpu.matmul %103, %108, %cst_64 {dimension_numbers = #tpu.dot_dimension_numbers<[1], [0], [0], [1], [0, 0, 1, 1], [], []>} : vector<16x4xf32>, vector<4x4xf32>, vector<16x4xf32> -> vector<16x4xf32>
      %110 = arith.addf %102, %109 : vector<16x4xf32>
      %c9_65 = arith.constant 9 : index
      %c0_66 = arith.constant 0 : index
      %111 = vector.load %arg9[%c9_65, %c0_66] : memref<25x4xf32, #tpu.memory_space<vmem>>, vector<16x4xf32>
      %c3_i32_67 = arith.constant 3 : i32
      %112 = arith.muli %arg10, %c3_i32_67 : i32
      %c2_i32_68 = arith.constant 2 : i32
      %113 = arith.addi %112, %c2_i32_68 : i32
      %114 = arith.index_cast %113 : i32 to index
      %c0_69 = arith.constant 0 : index
      %c0_70 = arith.constant 0 : index
      %115 = vector.load %arg4[%114, %c0_69, %c0_70] : memref<6x4x4xf32, #tpu.memory_space<vmem>>, vector<1x4x4xf32>
      %116 = vector.shape_cast %115 : vector<1x4x4xf32> to vector<4x4xf32>
      %cst_71 = arith.constant dense<0.000000e+00> : vector<16x4xf32>
      %117 = tpu.matmul %111, %116, %cst_71 {dimension_numbers = #tpu.dot_dimension_numbers<[1], [0], [0], [1], [0, 0, 1, 1], [], []>} : vector<16x4xf32>, vector<4x4xf32>, vector<16x4xf32> -> vector<16x4xf32>
      %118 = arith.addf %110, %117 : vector<16x4xf32>
      scf.yield %118 : vector<16x4xf32>
    }
    %c2_i32_4 = arith.constant 2 : i32
    %c0_5 = arith.constant 0 : index
    %c0_6 = arith.constant 0 : index
    %7 = vector.load %arg5[%c0_5, %c0_6] : memref<1x4xf32, #tpu.memory_space<vmem>>, vector<1x4xf32>
    %c0_7 = arith.constant 0 : index
    %c0_8 = arith.constant 0 : index
    %8 = vector.load %arg6[%c0_7, %c0_8] : memref<1x4xf32, #tpu.memory_space<vmem>>, vector<1x4xf32>
    %cst_9 = arith.constant dense<0.000000e+00> : vector<16xf32>
    %9 = vector.multi_reduction <add>, %6, %cst_9 [1] : vector<16x4xf32> to vector<16xf32>
    %10 = vector.shape_cast %9 : vector<16xf32> to vector<16x1xf32>
    %cst_10 = arith.constant 4.000000e+00 : f32
    %11 = vector.broadcast %cst_10 : f32 to vector<16x1xf32>
    %12 = arith.divf %10, %11 : vector<16x1xf32>
    %13 = arith.mulf %6, %6 : vector<16x4xf32>
    %cst_11 = arith.constant dense<0.000000e+00> : vector<16xf32>
    %14 = vector.multi_reduction <add>, %13, %cst_11 [1] : vector<16x4xf32> to vector<16xf32>
    %15 = vector.shape_cast %14 : vector<16xf32> to vector<16x1xf32>
    %cst_12 = arith.constant 4.000000e+00 : f32
    %16 = vector.broadcast %cst_12 : f32 to vector<16x1xf32>
    %17 = arith.divf %15, %16 : vector<16x1xf32>
    %18 = arith.mulf %12, %12 : vector<16x1xf32>
    %19 = arith.subf %17, %18 : vector<16x1xf32>
    %cst_13 = arith.constant 0.000000e+00 : f32
    %20 = vector.broadcast %cst_13 : f32 to vector<16x1xf32>
    %21 = arith.maximumf %19, %20 : vector<16x1xf32>
    %22 = vector.broadcast %12 : vector<16x1xf32> to vector<16x4xf32>
    %23 = arith.subf %6, %22 : vector<16x4xf32>
    %cst_14 = arith.constant 9.99999974E-6 : f32
    %24 = vector.broadcast %cst_14 : f32 to vector<16x1xf32>
    %25 = arith.addf %21, %24 : vector<16x1xf32>
    %26 = math.rsqrt %25 : vector<16x1xf32>
    %27 = vector.broadcast %26 : vector<16x1xf32> to vector<16x4xf32>
    %28 = arith.mulf %23, %27 : vector<16x4xf32>
    %29 = vector.broadcast %7 : vector<1x4xf32> to vector<16x4xf32>
    %30 = arith.mulf %28, %29 : vector<16x4xf32>
    %31 = vector.broadcast %8 : vector<1x4xf32> to vector<16x4xf32>
    %32 = arith.addf %30, %31 : vector<16x4xf32>
    %cst_15 = arith.constant 0.000000e+00 : f32
    %33 = vector.broadcast %cst_15 : f32 to vector<16x4xf32>
    %34 = arith.cmpf oge, %32, %33 : vector<16x4xf32>
    %cst_16 = arith.constant 0.00999999977 : f32
    %35 = vector.broadcast %cst_16 : f32 to vector<16x4xf32>
    %36 = arith.mulf %35, %32 : vector<16x4xf32>
    %37 = arith.select %34, %32, %36 : vector<16x4xi1>, vector<16x4xf32>
    %c8 = arith.constant 8 : index
    %c0_17 = arith.constant 0 : index
    %38 = vector.load %arg9[%c8, %c0_17] : memref<25x4xf32, #tpu.memory_space<vmem>>, vector<16x4xf32>
    tpu.vector_store %arg9[%c8, %c0_17], %37 {strides = array<i32>} : memref<25x4xf32, #tpu.memory_space<vmem>>, vector<16x4xf32>,
    %c8_18 = arith.constant 8 : index
    %c0_19 = arith.constant 0 : index
    %39 = tpu.strided_load %arg9[%c8_18, %c0_19] {strides = array<i32: 2, 1>} : memref<25x4xf32, #tpu.memory_space<vmem>>, vector<8x4xf32>
    %c1 = arith.constant 1 : index
    %c0_20 = arith.constant 0 : index
    %c0_21 = arith.constant 0 : index
    %40 = vector.load %arg7[%c1, %c0_20, %c0_21] : memref<4x4x8xf32, #tpu.memory_space<vmem>>, vector<1x4x8xf32>
    %41 = vector.shape_cast %40 : vector<1x4x8xf32> to vector<4x8xf32>
    %cst_22 = arith.constant dense<0.000000e+00> : vector<8x8xf32>
    %42 = tpu.matmul %39, %41, %cst_22 {dimension_numbers = #tpu.dot_dimension_numbers<[1], [0], [0], [1], [0, 0, 1, 1], [], []>} : vector<8x4xf32>, vector<4x8xf32>, vector<8x8xf32> -> vector<8x8xf32>
    %c7_23 = arith.constant 7 : index
    %c0_24 = arith.constant 0 : index
    %43 = tpu.strided_load %arg9[%c7_23, %c0_24] {strides = array<i32: 2, 1>} : memref<25x4xf32, #tpu.memory_space<vmem>>, vector<8x4xf32>
    %c0_25 = arith.constant 0 : index
    %c0_26 = arith.constant 0 : index
    %c0_27 = arith.constant 0 : index
    %44 = vector.load %arg7[%c0_25, %c0_26, %c0_27] : memref<4x4x8xf32, #tpu.memory_space<vmem>>, vector<1x4x8xf32>
    %45 = vector.shape_cast %44 : vector<1x4x8xf32> to vector<4x8xf32>
    %cst_28 = arith.constant dense<0.000000e+00> : vector<8x8xf32>
    %46 = tpu.matmul %43, %45, %cst_28 {dimension_numbers = #tpu.dot_dimension_numbers<[1], [0], [0], [1], [0, 0, 1, 1], [], []>} : vector<8x4xf32>, vector<4x8xf32>, vector<8x8xf32> -> vector<8x8xf32>
    %47 = arith.addf %42, %46 : vector<8x8xf32>
    %c9 = arith.constant 9 : index
    %c0_29 = arith.constant 0 : index
    %48 = tpu.strided_load %arg9[%c9, %c0_29] {strides = array<i32: 2, 1>} : memref<25x4xf32, #tpu.memory_space<vmem>>, vector<8x4xf32>
    %c2 = arith.constant 2 : index
    %c0_30 = arith.constant 0 : index
    %c0_31 = arith.constant 0 : index
    %49 = vector.load %arg7[%c2, %c0_30, %c0_31] : memref<4x4x8xf32, #tpu.memory_space<vmem>>, vector<1x4x8xf32>
    %50 = vector.shape_cast %49 : vector<1x4x8xf32> to vector<4x8xf32>
    %cst_32 = arith.constant dense<0.000000e+00> : vector<8x8xf32>
    %51 = tpu.matmul %48, %50, %cst_32 {dimension_numbers = #tpu.dot_dimension_numbers<[1], [0], [0], [1], [0, 0, 1, 1], [], []>} : vector<8x4xf32>, vector<4x8xf32>, vector<8x8xf32> -> vector<8x8xf32>
    %52 = arith.addf %47, %51 : vector<8x8xf32>
    %c10 = arith.constant 10 : index
    %c0_33 = arith.constant 0 : index
    %53 = tpu.strided_load %arg9[%c10, %c0_33] {strides = array<i32: 2, 1>} : memref<25x4xf32, #tpu.memory_space<vmem>>, vector<8x4xf32>
    %c3 = arith.constant 3 : index
    %c0_34 = arith.constant 0 : index
    %c0_35 = arith.constant 0 : index
    %54 = vector.load %arg7[%c3, %c0_34, %c0_35] : memref<4x4x8xf32, #tpu.memory_space<vmem>>, vector<1x4x8xf32>
    %55 = vector.shape_cast %54 : vector<1x4x8xf32> to vector<4x8xf32>
    %cst_36 = arith.constant dense<0.000000e+00> : vector<8x8xf32>
    %56 = tpu.matmul %53, %55, %cst_36 {dimension_numbers = #tpu.dot_dimension_numbers<[1], [0], [0], [1], [0, 0, 1, 1], [], []>} : vector<8x4xf32>, vector<4x8xf32>, vector<8x8xf32> -> vector<8x8xf32>
    %57 = arith.addf %52, %56 : vector<8x8xf32>
    %c0_37 = arith.constant 0 : index
    %c0_38 = arith.constant 0 : index
    %c0_39 = arith.constant 0 : index
    %58 = vector.load %arg8[%c0_37, %c0_38, %c0_39] : memref<1x8x8xf32, #tpu.memory_space<vmem>>, vector<1x8x8xf32>
    %59 = vector.shape_cast %58 : vector<1x8x8xf32> to vector<8x8xf32>
    %60 = vector.shape_cast %57 : vector<8x8xf32> to vector<1x8x8xf32>
    tpu.vector_store %arg8[%c0_37, %c0_38, %c0_39], %60 {strides = array<i32>} : memref<1x8x8xf32, #tpu.memory_space<vmem>>, vector<1x8x8xf32>,
    return
  }
  func.func @transform_0(%arg0: i32) -> (i32, i32, i32) {
    %c0_i32 = arith.constant 0 : i32
    %c0_i32_0 = arith.constant 0 : i32
    %c0_i32_1 = arith.constant 0 : i32
    return %arg0, %c0_i32, %c0_i32_0 : i32, i32, i32
  }
  func.func @transform_1(%arg0: i32) -> (i32, i32) {
    %c0_i32 = arith.constant 0 : i32
    %c0_i32_0 = arith.constant 0 : i32
    %c0_i32_1 = arith.constant 0 : i32
    return %c0_i32, %c0_i32_0 : i32, i32
  }
  func.func @transform_2(%arg0: i32) -> (i32, i32) {
    %c0_i32 = arith.constant 0 : i32
    %c0_i32_0 = arith.constant 0 : i32
    %c0_i32_1 = arith.constant 0 : i32
    return %c0_i32, %c0_i32_0 : i32, i32
  }
  func.func @transform_3(%arg0: i32) -> (i32, i32, i32) {
    %c0_i32 = arith.constant 0 : i32
    %c0_i32_0 = arith.constant 0 : i32
    %c0_i32_1 = arith.constant 0 : i32
    %c0_i32_2 = arith.constant 0 : i32
    return %c0_i32, %c0_i32_0, %c0_i32_1 : i32, i32, i32
  }
  func.func @transform_4(%arg0: i32) -> (i32, i32) {
    %c0_i32 = arith.constant 0 : i32
    %c0_i32_0 = arith.constant 0 : i32
    %c0_i32_1 = arith.constant 0 : i32
    return %c0_i32, %c0_i32_0 : i32, i32
  }
  func.func @transform_5(%arg0: i32) -> (i32, i32) {
    %c0_i32 = arith.constant 0 : i32
    %c0_i32_0 = arith.constant 0 : i32
    %c0_i32_1 = arith.constant 0 : i32
    return %c0_i32, %c0_i32_0 : i32, i32
  }
  func.func @transform_6(%arg0: i32) -> (i32, i32, i32) {
    %c0_i32 = arith.constant 0 : i32
    %c0_i32_0 = arith.constant 0 : i32
    %c0_i32_1 = arith.constant 0 : i32
    %c0_i32_2 = arith.constant 0 : i32
    return %c0_i32, %c0_i32_0, %c0_i32_1 : i32, i32, i32
  }
  func.func @transform_7(%arg0: i32) -> (i32, i32, i32) {
    %c0_i32 = arith.constant 0 : i32
    %c0_i32_0 = arith.constant 0 : i32
    %c0_i32_1 = arith.constant 0 : i32
    return %arg0, %c0_i32, %c0_i32_0 : i32, i32, i32
  }
}

</mosaic_0001>

<bundles_post_ra>
// kernel: encoder_forward.5
= control target key start
LH: loop header
LB: loop body
LE: loop exit
PB: predicated region body
PF: predicated region fallthrough
CT: control target
= control target key end

     0   :  { %9 = vsyncpa [#allocation4], 0  ;;  %s857_s0 = inlined_call_operand.vmem [shape: f32[2,4,16], index: 0, kind: input, shape index: {}]   ;;  %s858_s1 = inlined_call_operand.vmem [shape: f32[4,16], index: 1, kind: input, shape index: {}]   ;;  %s859_s2 = inlined_call_operand.vmem [shape: f32[4,16], index: 2, kind: input, shape index: {}]   ;;  %s860_s3 = inlined_call_operand.hbm [shape: f32[12,16,16], index: 3, kind: input, shape index: {}]   ;;  %s861_s4 = inlined_call_operand.hbm [shape: f32[2,4,16], index: 4, kind: output, shape index: {}]  }
   0x1   :  { %10 = vsyncpa [#allocation5], 0 }
   0x2   :  { %12 = vsyncpa [#allocation5 + $0x1], 0  ;;  %s708_s15 = smov 0   ;;  %s710_s16 = smov 0  }
   0x3   :  { %s712_s17 = smov 0   ;;  %s714_s18 = smov 0  }
   0x4 LB: > { %s729_s19 = sadd.s32 4294967295, %s668_s18   ;;  %s466_s20 = sadd.s32 4294967294, %s668_s18   ;;  %s668_s18 = sphi %s714_s18, %s868_s18   ;;  %s664_s17 = sphi %s712_s17, %s867_s17   ;;  %s660_s16 = sphi %s710_s16, %s866_s16   ;;  %s656_s15 = sphi %s708_s15, %s865_s15  }
   0x5   : > { %s733_s21 = sadd.s32 1, %s668_s18   ;;  %s114_s22 = sadd.s32 1, %s664_s17 }
   0x6   : > { %s111_s23 = ssub.s32 %s668_s18, %s733_s21  ;;  %p124_p0 = scmp.ne.s32.totalorder %s664_s17, %s660_s16 }
   0x7   : > { %p112_p1 = scmp.eq.s32.totalorder %s111_s23, 0  ;;  %p125_p2 = scmp.eq.s32.totalorder %s729_s19, 1 }
   0x8   : > { %p130_p3 = scmp.ne.s32.totalorder %s660_s16, %s656_s15  ;;  %p131_p4 = scmp.eq.s32.totalorder %s466_s20, 1 }
   0x9   : > { %s744_s24 = scalar_select %p112_p1, %s664_s17, %s114_s22  }
   0xa   : > { %p746_p5 = por %p125_p2, %p124_p0  ;;  %p750_p6 = por %p131_p4, %p130_p3 }
   0xb   : > { %p467_p7 = scmp.ge.s32.totalorder %s668_s18, 1  ;;  %p138_p8 = scmp.lt.s32.totalorder %s668_s18, 3 }
   0xc   : > { %p502_p9 = scmp.eq.s32.totalorder %s729_s19, 0  ;;  %s155_s29 = sshll.u32 %s860_s3, 4  ;;  %s156_s29 = int_to_ptr.hbm [resolvable:$true] %s155_s29 }
   0xd   : > { %p139_p10 = pnand %p467_p7, %p138_p8  ;;  %s678_s30 = smov [#allocation3]  }
   0xe   : > { %s157_s5 = sshll.u32 %s678_s30, 4  ;;  %s679_s6 = smov 128   ;;  %s158_s5 = int_to_ptr.vmem [resolvable:$true] %s157_s5 }
   0xf   : > { %p494_p11 = pneg %p139_p10  ;;  %s680_s7 = smov 8  }
  0x10   : > { %180 = sbr.rel (%p139_p10) target bundleno = 337 (0x151), region = 36 }
  0x11   : > { %p495_p12 = pnand %p502_p9, %p494_p11 }
  0x13   : > { %497 = dma.hbm_to_vmem [thread:$0]  (!%p495_p12), %s156_s29, 3072, %s158_s5, [#allocation4], %s679_s6, %s679_s6, %s680_s7  }
  0x15   : > { %647 = dma.done.wait (%p502_p9), [#allocation4], 3072  }
  0x16   : > { %649 = vsyncadd (%p502_p9), [#allocation4], 4294964224  ;;  %p206_p13 = scmp.lt.s32.totalorder %s729_s19, 1  ;;  %s203_s8 = sand.u32 1, %s660_s16   ;;  %vm211_vm0 = vcmask 122880   ;;  %v681_v0 = vmov 0.0  }
  0x17   : > { %s770_s9 = sshll.u32 %s203_s8, 2  ;;  %212 = vst.msk [vmem:[#allocation2 + $0x7] sm:$0x1] %vm211_vm0, %v681_v0  ;;  %s779_s22 = smov 0  }
  0x18   : > { %s207_s10 = scalar_select %p206_p13, %s729_s19, 1  ;;  %213 = vst.msk [vmem:[#allocation2 + $0xc] sm:$0x1] %vm211_vm0, %v681_v0 }
  0x19   : > { %s205_s20 = scalar_lea.vmem [#allocation6], %s770_s9 }
  0x1a   : > { %s473_s11 = sshll.u32 %s207_s10, 2 }
  0x1b   : > { %s209_s14 = scalar_lea.vmem %s857_s0, %s473_s11 }
  0x1c   : > { %v210_v1 = vld [vmem:[%s209_s14] sm:$0xf]  }
  0x1d LB: >> { %vm225_vm1 = vcmask 125952   ;;  %v237_v3 = vmul.f32 %v672_v1, %v672_v1  ;;  %s221_s28 = scalar_lea.vmem %s858_s1, %s676_s22  ;;  %s223_s5 = scalar_lea.vmem %s859_s2, %s676_s22  ;;  %v682_v5 = vmov 16.0   ;;  %vm272_vm7 = vcmask 130048   ;;  %s676_s22 = sphi %s779_s22, %s219_s22   ;;  %v672_v1 = vphi %v210_v1, %v864_v1  }
  0x1e   : >> { %v226_v2 = vsel %vm225_vm1, %v672_v1, 0.0  ;;  %560 = vrcp.f32 %v682_v5  ;;  %s474_s6 = smul.u32 48, %s676_s22  ;;  %v558_v33 = vld [vmem:[%s221_s28] ss:$0 sm:$0xff]  ;;  %s219_s22 = sadd.s32 1, %s676_s22  }
  0x1f   : >> { %227 = vadd.xlane.f32.xlu0 %v226_v2  ;;  %v238_v4 = vsel %vm225_vm1, %v237_v3, 0.0  ;;  %v559_v36 = vld [vmem:[%s223_s5] ss:$0 sm:$0xff]  ;;  %p216_p0 = scmp.ge.s32.totalorder %s219_s22, 4  }
  0x20   : >> { %s269_s7 = scalar_lea.vmem [#allocation3], %s474_s6  ;;  %s485_s14 = sshll.u32 (%p216_p0), %s729_s19, 2 }
  0x21   : >> { %v271_v18 = vld [vmem:[%s269_s7 + $0x8] sm:$0xff]  ;;  %v478_v19 = vld [vmem:[%s269_s7 + $0x18] sm:$0xff]  ;;  %v270_v22 = vld [vmem:[%s269_s7] sm:$0xff]  ;;  %s370_s28 = scalar_lea.hbm (%p216_p0), %s861_s4, %s485_s14  ;;  %s372_s29 = sshll.u32 (%p216_p0), %s205_s20, 4  ;;  %s373_s29 = int_to_ptr.vmem [resolvable:$true] %s372_s29 }
  0x22   : >> { %v482_v20 = vld [vmem:[%s269_s7 + $0x28] sm:$0xff]  ;;  %290 = vmatpush.msra.mxu0 %v271_v18  ;;  %320 = vmatpush.msra.mxu1 %v478_v19  ;;  %v477_v23 = vld [vmem:[%s269_s7 + $0x10] sm:$0xff]  ;;  %v481_v24 = vld [vmem:[%s269_s7 + $0x20] sm:$0xff]  ;;  %s374_s30 = sshll.u32 (%p216_p0), %s370_s28, 4  ;;  %s360_s22 = scalar_lea.sflag (%p216_p0), [#allocation5], %s203_s8  ;;  %s375_s30 = int_to_ptr.hbm [resolvable:$true] %s374_s30 }
  0x23   : >> { %350 = vmatpush.msra.mxu2 %v482_v20  ;;  %s608_s5 = sshra.s32 (%p216_p0), %s375_s30, 4  ;;  %s614_s10 = scalar_lea.hbm (%p216_p0), %s861_s4, 8  ;;  %s609_s5 = int_to_ptr.hbm [resolvable:$true] %s608_s5 }
  0x24   : >> { %v561_v6 = vpop.eup %560  ;;  %291 = vmatpush.msra.mxu0 %v270_v22  ;;  %321 = vmatpush.msra.mxu1 %v477_v23  ;;  %s610_s6 = scalar_lea.hbm (%p216_p0), %s609_s5, 4  ;;  %p615_p4 = scmp.lt.s32.totalorder (%p216_p0), %s609_s5, %s861_s4 }
  0x25   : >> { %v230_v7 = vmul.f32 16.0, %v561_v6  ;;  %vm234_vm2 = vweird.f32 %v561_v6  ;;  %351 = vmatpush.msra.mxu2 %v481_v24  ;;  %p611_p1 = scmp.ne.s32.totalorder (%p216_p0), %s609_s5, %s610_s6  ;;  %p616_p7 = scmp.lt.s32.totalorder (%p216_p0), %s614_s10, %s610_s6 }
  0x27   : >> { %239 = vadd.xlane.f32.xlu0 %v238_v4  ;;  %v231_v8 = vsub.f32 1.0, %v230_v7  ;;  %p612_p2 = pnand (%p216_p0), %p611_p1, %p746_p5  ;;  %p617_p8 = por (%p216_p0), %p616_p7, %p615_p4 }
  0x29   : >> { %v232_v9 = vmul.f32 %v561_v6, %v231_v8  ;;  %p613_p3 = pneg (%p216_p0), %p612_p2 }
  0x2b   : >> { %v233_v10 = vadd.f32 %v561_v6, %v232_v9  ;;  %p618_p9 = pnand (%p216_p0), %p617_p8, %p613_p3 }
  0x2d   : >> { %v235_v12 = vsel %vm234_vm2, %v561_v6, %v233_v10 }
  0x92   : >> { %v228_v11 = vpop.xlane.xlu0 %227 }
  0x93   : >> { %v236_v13 = vmul.f32 %v235_v12, %v228_v11 }
  0x95   : >> { %v242_v15 = vmul.f32 %v236_v13, %v236_v13  ;;  %v245_v32 = vsub.f32 %v672_v1, %v236_v13 }
  0x9a   : >> { %v240_v14 = vpop.xlane.xlu0 %239 }
  0x9b   : >> { %v241_v16 = vmul.f32 %v240_v14, %v235_v12 }
  0x9d   : >> { %v243_v17 = vsub.f32 %v241_v16, %v242_v15 }
  0x9f   : >> { %v244_v21 = vmax.f32 %v243_v17, 0.0 }
  0xa1   : >> { %v246_v25 = vadd.f32 1e-05, %v244_v21 }
  0xa3   : >> { %562 = vrsqrt.f32 %v246_v25  ;;  %vm253_vm4 = vweird.f32 %v246_v25 }
  0xa9   : >> { %v563_v26 = vpop.eup %562 }
  0xaa   : >> { %v248_v27 = vmul.f32 %v563_v26, %v246_v25  ;;  %vm254_vm3 = vweird.f32 %v563_v26 }
  0xab   : >> { %vm255_vm5 = vmor %vm253_vm4, %vm254_vm3 }
  0xac   : >> { %v249_v28 = vmul.f32 %v563_v26, %v248_v27 }
  0xae   : >> { %v250_v29 = vmul.f32 0.5, %v249_v28 }
  0xb0   : >> { %v251_v30 = vsub.f32 1.5, %v250_v29 }
  0xb2   : >> { %v252_v31 = vmul.f32 %v563_v26, %v251_v30 }
  0xb4   : >> { %v256_v34 = vsel %vm255_vm5, %v563_v26, %v252_v31 }
  0xb5   : >> { %v257_v35 = vmul.f32 %v256_v34, %v245_v32 }
  0xb7   : >> { %v259_v37 = vmul.f32 %v558_v33, %v257_v35 }
  0xb9   : >> { %v261_v38 = vadd.f32 %v559_v36, %v259_v37 }
  0xbb   : >> { %vm262_vm6 = vcmp.ge.f32.partialorder %v261_v38, 0.0  ;;  %v263_v39 = vmul.f32 0.01, %v261_v38 }
  0xbd   : >> { %v264_v40 = vsel %vm262_vm6, %v261_v38, %v263_v39 }
  0xbe   : >> { %265 = vst.msk [vmem:[#allocation2 + $0x8] sm:$0xf] %vm225_vm1, %v264_v40 }
  0xc5   : >> { %v266_v41 = vld [vmem:[#allocation2 + $0x7] sm:$0xf] }
  0xc6   : >> { %v297_v42 = vld [vmem:[#allocation2 + $0x8] sm:$0xf]  ;;  %475 = vmatmul.msk.f32.vlgmr.msra.gmra.mxu0 %vm272_vm7, %v266_v41 }
  0xc7   : >> { %v327_v43 = vld [vmem:[#allocation2 + $0x9] sm:$0xf]  ;;  %479 = vmatmul.msk.f32.vlgmr.msra.gmra.mxu1 %vm272_vm7, %v297_v42 }
  0xc8   : >> { %483 = vmatmul.msk.f32.vlgmr.msra.gmra.mxu2 %vm272_vm7, %v327_v43 }
 0x143   : >> { %v293_v44 = vpop.f32.mrf.mxu0 }
 0x144   : >> { %v296_v45 = vadd.f32 %v672_v1, %v293_v44  ;;  %v323_v46 = vpop.f32.mrf.mxu1 }
 0x146   : >> { %v326_v47 = vadd.f32 %v323_v46, %v296_v45 }
 0x14a   : > { %218 = sbr.rel (!%p216_p0) target bundleno = 29 (0x1d), region = 88 }
 0x14b   : >> { %v353_v48 = vpop.f32.mrf.mxu2 }
 0x14c   : >> { %v356_v49 = vadd.f32 %v353_v48, %v326_v47  }
 0x14e   : >> { %v864_v1 = vmov %v356_v49  ;;  %358 = vst.msk [vmem:[%s205_s20] sm:$0xf] (%p216_p0), %vm225_vm1, %v356_v49 }
 0x14f   : > { %621 = shalt.err (!%p618_p9)
}
 0x150   : > { %492 = dma.vmem_to_hbm [thread:$0]  (%p746_p5), %s373_s29, 64, %s375_s30, %s360_s22  }
 0x151 PF: > { %p504_p10 = scmp.ge.s32.totalorder %s668_s18, 2  ;;  %s386_s8 = sand.u32 1, %s656_s15  }
 0x152   : > { %s387_s9 = scalar_lea.sflag [#allocation5], %s386_s8 }
 0x153   : > { %p499_p11 = pnand %p504_p10, %p750_p6 }
 0x155   : > { %p500_p12 = pneg %p499_p11 }
 0x157   : > { %651 = dma.done.wait (%p500_p12), %s387_s9, 64  }
 0x158   : > { %653 = vsyncadd (%p500_p12), %s387_s9, 4294967232  ;;  %p15_p13 = scmp.ge.s32.totalorder %s733_s21, 4   ;;  %s865_s15 = smov %s660_s16 }
 0x159   : > { %s866_s16 = smov %s664_s17  ;;  %s867_s17 = smov %s744_s24 }
 0x15a   : > { %s868_s18 = smov %s733_s21  ;;  %17 = sbr.rel (!%p15_p13) target bundleno = 4 (0x4), region = 99 }
 0x15f   :  { %393 = vsyncpa [#allocation4], 1 }
 0x160   :  { %395 = vsyncpa [#allocation4 + $0x1], 1 }
 0x161   :  { %396 = vsyncpa [#allocation5], 1 }
 0x162   :  { %398 = vsyncpa [#allocation5 + $0x1], 1 }

// kernel: encoder_forward.4
= control target key start
LH: loop header
LB: loop body
LE: loop exit
PB: predicated region body
PF: predicated region fallthrough
CT: control target
= control target key end

     0   :  { %12 = vsyncpa [#allocation4], 0  ;;  %s1253_s0 = inlined_call_operand.vmem [shape: f32[2,8,8], index: 0, kind: input, shape index: {}]   ;;  %s1254_s1 = inlined_call_operand.hbm [shape: f32[2,8], index: 1, kind: input, shape index: {}]   ;;  %s1255_s2 = inlined_call_operand.hbm [shape: f32[2,8], index: 2, kind: input, shape index: {}]   ;;  %s1256_s3 = inlined_call_operand.vmem [shape: f32[6,8,8], index: 3, kind: input, shape index: {}]   ;;  %s1257_s4 = inlined_call_operand.hbm [shape: f32[1,8], index: 4, kind: input, shape index: {}]   ;;  %s1258_s5 = inlined_call_operand.hbm [shape: f32[1,8], index: 5, kind: input, shape index: {}]   ;;  %s1259_s6 = inlined_call_operand.hbm [shape: f32[4,8,16], index: 6, kind: input, shape index: {}]   ;;  %s1260_s7 = inlined_call_operand.vmem [shape: f32[2,4,16], index: 7, kind: output, shape index: {}]  }
   0x1   :  { %13 = vsyncpa [#allocation6], 0 }
   0x2   :  { %14 = vsyncpa [#allocation9], 0  ;;  %s1128_s24 = smov 0  }
   0x3 LB: > { %s227_s27 = sshll.u32 %s1255_s2, 4  ;;  %s1137_s28 = sadd.s32 4294967295, %s1069_s24   ;;  %s1069_s24 = sphi %s1128_s24, %s20_s24   ;;  %s228_s27 = int_to_ptr.hbm [resolvable:$true] %s227_s27 }
   0x4   : > { %p775_p0 = scmp.ge.s32.totalorder %s1069_s24, 1  ;;  %p203_p1 = scmp.lt.s32.totalorder %s1069_s24, 3 }
   0x5   : > { %p840_p2 = scmp.eq.s32.totalorder %s1137_s28, 0  ;;  %s1079_s30 = smov [#allocation5]  }
   0x6   : > { %p1142_p3 = pnand %p775_p0, %p203_p1  ;;  %s229_s8 = sshll.u32 %s1079_s30, 4  ;;  %s230_s8 = int_to_ptr.vmem [resolvable:$true] %s229_s8 }
   0x7   : > { %s254_s11 = sshll.u32 %s1258_s5, 4  ;;  %s215_s14 = sshll.u32 %s1254_s1, 4  ;;  %s255_s11 = int_to_ptr.hbm [resolvable:$true] %s254_s11  ;;  %s216_s14 = int_to_ptr.hbm [resolvable:$true] %s215_s14 }
   0x8   : > { %p824_p4 = pneg %p1142_p3  ;;  %s1080_s16 = smov [#allocation8]  }
   0x9   : > { %s256_s17 = sshll.u32 %s1080_s16, 4  ;;  %s1081_s18 = smov [#allocation3]   ;;  %s257_s17 = int_to_ptr.vmem [resolvable:$true] %s256_s17 }
   0xa   : > { %p1156_p5 = pnand %p840_p2, %p824_p4  ;;  %s217_s19 = sshll.u32 %s1081_s18, 4  ;;  %s218_s19 = int_to_ptr.vmem [resolvable:$true] %s217_s19 }
   0xb   : > { %s242_s22 = sshll.u32 %s1257_s4, 4  ;;  %s265_s26 = sshll.u32 %s1259_s6, 4  ;;  %s243_s22 = int_to_ptr.hbm [resolvable:$true] %s242_s22  ;;  %s266_s26 = int_to_ptr.hbm [resolvable:$true] %s265_s26 }
   0xc   : > { %830 = dma.hbm_to_vmem [thread:$0]  (!%p1156_p5), %s228_s27, 32, %s230_s8, [#allocation6]  }
   0xd   : > { %836 = dma.hbm_to_vmem [thread:$0]  (!%p1156_p5), %s255_s11, 16, %s257_s17, [#allocation9]  }
   0xe   : > { %827 = dma.hbm_to_vmem [thread:$0]  (!%p1156_p5), %s216_s14, 32, %s218_s19, [#allocation4]  }
   0xf   : > { %s1082_s30 = smov [#allocation7]   ;;  %s1083_s27 = smov [#allocation10]  }
  0x10   : > { %s244_s9 = sshll.u32 %s1082_s30, 4  ;;  %s267_s8 = sshll.u32 %s1083_s27, 4  ;;  %s245_s9 = int_to_ptr.vmem [resolvable:$true] %s244_s9  ;;  %s268_s8 = int_to_ptr.vmem [resolvable:$true] %s267_s8 }
  0x11   : > { %833 = dma.hbm_to_vmem [thread:$0]  (!%p1156_p5), %s243_s22, 16, %s245_s9, [#allocation6]  }
  0x12   : > { %s1084_s10 = smov 128   ;;  %s1085_s11 = smov 8  }
  0x13   : > { %839 = dma.hbm_to_vmem [thread:$0]  (!%p1156_p5), %s266_s26, 512, %s268_s8, [#allocation9], %s1084_s10, %s1084_s10, %s1085_s11  }
  0x14   : > { %290 = sbr.rel (%p1142_p3) target bundleno = 647 (0x287), region = 48 }
  0x19   : > { %1056 = dma.done.wait (%p840_p2), [#allocation4], 32  }
  0x1a   : > { %1058 = vsyncadd (%p840_p2), [#allocation4], 4294967264 }
  0x1b   : > { %1060 = dma.done.wait (%p840_p2), [#allocation6], 48  }
  0x1c   : > { %1062 = vsyncadd (%p840_p2), [#allocation6], 4294967248 }
  0x1d   : > { %1064 = dma.done.wait (%p840_p2), [#allocation9], 528  }
  0x1e   : > { %1066 = vsyncadd (%p840_p2), [#allocation9], 4294966768  ;;  %p341_p6 = scmp.lt.s32.totalorder %s1137_s28, 1  ;;  %vm350_vm0 = vcmask 57344   ;;  %v1086_v0 = vmov 0.0   ;;  %s1202_s19 = smov 0  }
  0x1f   : > { %351 = vst.msk [vmem:[#allocation2 + $0x7] sm:$0x1] %vm350_vm0, %v1086_v0 }
  0x20   : > { %s1265_s28 = smov (!%p341_p6, %s1137_s28), 1  ;;  %352 = vst.msk [vmem:[#allocation2 + $0x10] sm:$0x1] %vm350_vm0, %v1086_v0 }
  0x21   : > { %s788_s29 = sshll.u32 %s1265_s28, 3  ;;  %s789_s12 = sshll.u32 %s1265_s28, 2 }
  0x22   : > { %s344_s15 = scalar_lea.vmem %s1253_s0, %s788_s29  ;;  %s1198_s18 = scalar_lea.vmem %s1260_s7, %s789_s12 }
  0x23   : > { %v349_v1 = vld [vmem:[%s344_s15] sm:$0xff]  }
  0x24 LB: >> { %vm364_vm1 = vcmask 64512   ;;  %v376_v3 = vmul.f32 %v1073_v1, %v1073_v1  ;;  %s360_s28 = scalar_lea.vmem [#allocation3], %s1077_s19  ;;  %s362_s20 = scalar_lea.vmem [#allocation5], %s1077_s19  ;;  %v1087_v5 = vmov 8.0   ;;  %s1077_s19 = sphi %s1202_s19, %s358_s19   ;;  %v1073_v1 = vphi %v349_v1, %v1263_v1  }
  0x25   : >> { %v365_v2 = vsel %vm364_vm1, %v1073_v1, 0.0  ;;  %885 = vrcp.f32 %v1087_v5  ;;  %s790_s21 = smul.u32 24, %s1077_s19  ;;  %v883_v30 = vld [vmem:[%s360_s28] ss:$0 sm:$0xff]  ;;  %s358_s19 = sadd.s32 1, %s1077_s19  }
  0x26   : >> { %366 = vadd.xlane.f32.xlu0 %v365_v2  ;;  %v377_v4 = vsel %vm364_vm1, %v376_v3, 0.0  ;;  %v884_v33 = vld [vmem:[%s362_s20] ss:$0 sm:$0xff]  ;;  %p355_p7 = scmp.ge.s32.totalorder %s358_s19, 2  }
  0x27   : >> { %s408_s25 = scalar_lea.vmem %s1256_s3, %s790_s21  ;;  %v545_v56 = vld [vmem:[#allocation10] sm:$0xff] (%p355_p7)  ;;  %v542_v57 = vld [vmem:[#allocation10 + $0x8] sm:$0xff] (%p355_p7)  ;;  %v595_v58 = vld [vmem:[#allocation10 + $0x10] sm:$0xff] (%p355_p7)  ;;  %vm648_vm11 = vcmask (%p355_p7), 125952  }
  0x28   : >> { %v409_v18 = vld [vmem:[%s408_s25] sm:$0xff]  ;;  %v793_v19 = vld [vmem:[%s408_s25 + $0x8] sm:$0xff]  ;;  %v796_v20 = vld [vmem:[%s408_s25 + $0x10] sm:$0xff] }
  0x29   : >> { %428 = vmatpush.msra.mxu0 %v409_v18  ;;  %457 = vmatpush.msra.mxu1 %v793_v19  ;;  %v623_v60 = vld [vmem:[#allocation10 + $0x18] sm:$0xff] (%p355_p7) }
  0x2a   : >> { %486 = vmatpush.msra.mxu2 %v796_v20  ;;  %642 = vmatpush.msra.mxu3 (%p355_p7), %v623_v60  ;;  %v889_v5 = vld [vmem:[#allocation7] ss:$0 sm:$0xff] (%p355_p7) }
  0x2b   : >> { %v886_v6 = vpop.eup %885 }
  0x2c   : >> { %v369_v7 = vmul.f32 8.0, %v886_v6  ;;  %vm373_vm2 = vweird.f32 %v886_v6 }
  0x2e   : >> { %378 = vadd.xlane.f32.xlu0 %v377_v4  ;;  %v370_v8 = vsub.f32 1.0, %v369_v7 }
  0x30   : >> { %v371_v9 = vmul.f32 %v886_v6, %v370_v8  ;;  %v890_v8 = vld [vmem:[#allocation8] ss:$0 sm:$0xff] (%p355_p7) }
  0x32   : >> { %v372_v10 = vadd.f32 %v886_v6, %v371_v9 }
  0x34   : >> { %v1217_v12 = vsel %vm373_vm2, %v886_v6, %v372_v10 }
  0x99   : >> { %v367_v11 = vpop.xlane.xlu0 %366 }
  0x9a   : >> { %v375_v13 = vmul.f32 %v1217_v12, %v367_v11 }
  0x9c   : >> { %v381_v15 = vmul.f32 %v375_v13, %v375_v13  ;;  %v384_v29 = vsub.f32 %v1073_v1, %v375_v13 }
  0xa1   : >> { %v379_v14 = vpop.xlane.xlu0 %378 }
  0xa2   : >> { %v380_v16 = vmul.f32 %v379_v14, %v1217_v12 }
  0xa4   : >> { %v382_v17 = vsub.f32 %v380_v16, %v381_v15 }
  0xa6   : >> { %v383_v21 = vmax.f32 %v382_v17, 0.0 }
  0xa8   : >> { %v385_v22 = vadd.f32 1e-05, %v383_v21 }
  0xaa   : >> { %887 = vrsqrt.f32 %v385_v22  ;;  %vm392_vm4 = vweird.f32 %v385_v22 }
  0xb0   : >> { %v888_v23 = vpop.eup %887 }
  0xb1   : >> { %v387_v24 = vmul.f32 %v888_v23, %v385_v22  ;;  %vm393_vm3 = vweird.f32 %v888_v23 }
  0xb2   : >> { %vm394_vm5 = vmor %vm392_vm4, %vm393_vm3 }
  0xb3   : >> { %v388_v25 = vmul.f32 %v888_v23, %v387_v24 }
  0xb5   : >> { %v389_v26 = vmul.f32 0.5, %v388_v25 }
  0xb7   : >> { %v390_v27 = vsub.f32 1.5, %v389_v26 }
  0xb9   : >> { %v391_v28 = vmul.f32 %v888_v23, %v390_v27 }
  0xbb   : >> { %v395_v31 = vsel %vm394_vm5, %v888_v23, %v391_v28 }
  0xbc   : >> { %v396_v32 = vmul.f32 %v395_v31, %v384_v29 }
  0xbe   : >> { %v398_v34 = vmul.f32 %v883_v30, %v396_v32 }
  0xc0   : >> { %v400_v35 = vadd.f32 %v884_v33, %v398_v34 }
  0xc2   : >> { %vm401_vm6 = vcmp.ge.f32.partialorder %v400_v35, 0.0  ;;  %v402_v36 = vmul.f32 0.01, %v400_v35 }
  0xc4   : >> { %v403_v37 = vsel %vm401_vm6, %v400_v35, %v402_v36 }
  0xc5   : >> { %404 = vst.msk [vmem:[#allocation2 + $0x8] sm:$0xff] %vm364_vm1, %v403_v37 }
  0xcc   : >> { %v405_v38 = vld [vmem:[#allocation2 + $0x7] sm:$0xff] }
  0xcd   : >> { %v434_v39 = vld [vmem:[#allocation2 + $0x8] sm:$0xff]  ;;  %791 = vmatmul.msk.f32.vlgmr.msra.gmra.mxu0 %vm364_vm1, %v405_v38 }
  0xce   : >> { %v463_v40 = vld [vmem:[#allocation2 + $0x9] sm:$0xff]  ;;  %794 = vmatmul.msk.f32.vlgmr.msra.gmra.mxu1 %vm364_vm1, %v434_v39  ;;  %564 = vmatpush.msra.mxu0 (%p355_p7), %v545_v56 }
  0xcf   : >> { %797 = vmatmul.msk.f32.vlgmr.msra.gmra.mxu2 %vm364_vm1, %v463_v40  ;;  %587 = vmatpush.msra.mxu1 (%p355_p7), %v542_v57 }
  0xd0   : > { %614 = vmatpush.msra.mxu2 (%p355_p7), %v595_v58 }
 0x14a   : >> { %v430_v41 = vpop.f32.mrf.mxu0 }
 0x14b   : >> { %v433_v42 = vadd.f32 %v1073_v1, %v430_v41  ;;  %v459_v43 = vpop.f32.mrf.mxu1 }
 0x14d   : >> { %v462_v44 = vadd.f32 %v459_v43, %v433_v42 }
 0x151   : > { %357 = sbr.rel (!%p355_p7) target bundleno = 36 (0x24), region = 118 }
 0x152   : >> { %v488_v45 = vpop.f32.mrf.mxu2 }
 0x153   : >> { %v491_v46 = vadd.f32 %v488_v45, %v462_v44  }
 0x155   : >> { %v1263_v1 = vmov %v491_v46  ;;  %v495_v47 = vsel (%p355_p7), %vm364_vm1, %v491_v46, 0.0  ;;  %v506_v48 = vmul.f32 (%p355_p7), %v491_v46, %v491_v46 }
 0x156   : > { %496 = vadd.xlane.f32.xlu0 %v495_v47 }
 0x157   : > { %v507_v49 = vsel %vm364_vm1, %v506_v48, 0.0 }
 0x15e   : > { %508 = vadd.xlane.f32.xlu0 %v507_v49 }
 0x1c9   : > { %v497_v50 = vpop.xlane.xlu0 %496 }
 0x1ca   : > { %v505_v51 = vmul.f32 %v497_v50, %v1217_v12 }
 0x1cc   : > { %v511_v53 = vmul.f32 %v505_v51, %v505_v51  ;;  %v514_v4 = vsub.f32 %v491_v46, %v505_v51 }
 0x1d1   : > { %v509_v52 = vpop.xlane.xlu0 %508 }
 0x1d2   : > { %v510_v54 = vmul.f32 %v509_v52, %v1217_v12 }
 0x1d4   : > { %v512_v55 = vsub.f32 %v510_v54, %v511_v53 }
 0x1d6   : > { %v513_v59 = vmax.f32 %v512_v55, 0.0 }
 0x1d8   : > { %v515_v61 = vadd.f32 1e-05, %v513_v59 }
 0x1da   : > { %891 = vrsqrt.f32 %v515_v61  ;;  %vm522_vm8 = vweird.f32 %v515_v61 }
 0x1e0   : > { %v892_v62 = vpop.eup %891 }
 0x1e1   : > { %v517_v63 = vmul.f32 %v892_v62, %v515_v61  ;;  %vm523_vm7 = vweird.f32 %v892_v62 }
 0x1e2   : > { %vm524_vm9 = vmor %vm522_vm8, %vm523_vm7 }
 0x1e3   : > { %v518_v0 = vmul.f32 %v892_v62, %v517_v63 }
 0x1e5   : > { %v519_v1 = vmul.f32 0.5, %v518_v0 }
 0x1e7   : > { %v520_v2 = vsub.f32 1.5, %v519_v1 }
 0x1e9   : > { %v521_v3 = vmul.f32 %v892_v62, %v520_v2 }
 0x1eb   : > { %v525_v6 = vsel %vm524_vm9, %v892_v62, %v521_v3 }
 0x1ec   : > { %v526_v7 = vmul.f32 %v525_v6, %v514_v4 }
 0x1ee   : > { %v530_v9 = vmul.f32 %v889_v5, %v526_v7 }
 0x1f0   : > { %v534_v10 = vadd.f32 %v890_v8, %v530_v9 }
 0x1f2   : > { %vm535_vm10 = vcmp.ge.f32.partialorder %v534_v10, 0.0  ;;  %v536_v11 = vmul.f32 0.01, %v534_v10 }
 0x1f4   : > { %v537_v12 = vsel %vm535_vm10, %v534_v10, %v536_v11 }
 0x1f5   : > { %538 = vst.msk [vmem:[#allocation2 + $0x8] sm:$0xff] %vm364_vm1, %v537_v12 }
 0x1fc   : > { %v544_v13 = vld [vmem:[#allocation2 + $0x7] ss:$2 sm:$0xf]  ;;  %v540_v14 = vld [vmem:[#allocation2 + $0x8] ss:$2 sm:$0xf] }
 0x1fd   : > { %798 = vmatmul.msk.f32.vlgmr.msra.gmra.mxu0 %vm364_vm1, %v544_v13  ;;  %799 = vmatmul.msk.f32.vlgmr.msra.gmra.mxu1 %vm364_vm1, %v540_v14  ;;  %v593_v15 = vld [vmem:[#allocation2 + $0x9] ss:$2 sm:$0xf]  ;;  %v621_v16 = vld [vmem:[#allocation2 + $0xa] ss:$2 sm:$0xf] }
 0x1fe   : > { %800 = vmatmul.msk.f32.vlgmr.msra.gmra.mxu2 %vm364_vm1, %v593_v15  ;;  %801 = vmatmul.msk.f32.vlgmr.msra.gmra.mxu3 %vm364_vm1, %v621_v16 }
 0x27a   : > { %v566_v17 = vpop.f32.mrf.mxu0  ;;  %v589_v18 = vpop.f32.mrf.mxu1 }
 0x27b   : > { %v590_v19 = vadd.f32 %v589_v18, %v566_v17 }
 0x281   : > { %v616_v20 = vpop.f32.mrf.mxu2  ;;  %v644_v22 = vpop.f32.mrf.mxu3 }
 0x282   : > { %v619_v21 = vadd.f32 %v616_v20, %v590_v19 }
 0x284   : > { %v647_v23 = vadd.f32 %v644_v22, %v619_v21 }
 0x286   : > { %649 = vst.msk [vmem:[%s1198_s18] sm:$0xf] %vm648_vm11, %v647_v23 }
 0x287 PF: > { %s20_s24 = sadd.s32 1, %s1069_s24  }
 0x288   : > { %p17_p8 = scmp.ge.s32.totalorder %s20_s24, 4  }
 0x28a   :  { %19 = sbr.rel (!%p17_p8) target bundleno = 3 (0x3), region = 129 }
 0x28f   :  { %669 = vsyncpa [#allocation4], 1 }
 0x290   :  { %671 = vsyncpa [#allocation4 + $0x1], 1 }
 0x291   :  { %672 = vsyncpa [#allocation6], 1 }
 0x292   :  { %673 = vsyncpa [#allocation9], 1 }

// kernel: encoder_forward.3
= control target key start
LH: loop header
LB: loop body
LE: loop exit
PB: predicated region body
PF: predicated region fallthrough
CT: control target
= control target key end

     0   :  { %12 = vsyncpa [#allocation4], 0  ;;  %s1530_s0 = inlined_call_operand.vmem [shape: f32[2,16,4], index: 0, kind: input, shape index: {}]   ;;  %s1531_s1 = inlined_call_operand.hbm [shape: f32[2,4], index: 1, kind: input, shape index: {}]   ;;  %s1532_s2 = inlined_call_operand.hbm [shape: f32[2,4], index: 2, kind: input, shape index: {}]   ;;  %s1533_s3 = inlined_call_operand.hbm [shape: f32[6,4,4], index: 3, kind: input, shape index: {}]   ;;  %s1534_s4 = inlined_call_operand.hbm [shape: f32[1,4], index: 4, kind: input, shape index: {}]   ;;  %s1535_s5 = inlined_call_operand.hbm [shape: f32[1,4], index: 5, kind: input, shape index: {}]   ;;  %s1536_s6 = inlined_call_operand.hbm [shape: f32[4,4,8], index: 6, kind: input, shape index: {}]   ;;  %s1537_s7 = inlined_call_operand.vmem [shape: f32[2,8,8], index: 7, kind: output, shape index: {}]  }
   0x1   :  { %13 = vsyncpa [#allocation6], 0 }
   0x2   :  { %14 = vsyncpa [#allocation9], 0 }
   0x3   :  { %15 = vsyncpa [#allocation12], 0  ;;  %s1352_s24 = smov 0  }
   0x4 LB: > { %s228_s27 = sshll.u32 %s1532_s2, 4  ;;  %s1361_s28 = sadd.s32 4294967295, %s1288_s24   ;;  %s1288_s24 = sphi %s1352_s24, %s21_s24   ;;  %s229_s27 = int_to_ptr.hbm [resolvable:$true] %s228_s27 }
   0x5   : > { %p919_p0 = scmp.ge.s32.totalorder %s1288_s24, 1  ;;  %p204_p1 = scmp.lt.s32.totalorder %s1288_s24, 3 }
   0x6   : > { %p1006_p2 = scmp.eq.s32.totalorder %s1361_s28, 0  ;;  %s1302_s30 = smov [#allocation5]  }
   0x7   : > { %p1366_p3 = pnand %p919_p0, %p204_p1  ;;  %s230_s8 = sshll.u32 %s1302_s30, 4  ;;  %s231_s8 = int_to_ptr.vmem [resolvable:$true] %s230_s8 }
   0x8   : > { %s254_s11 = sshll.u32 %s1534_s4, 4  ;;  %s216_s14 = sshll.u32 %s1531_s1, 4  ;;  %s255_s11 = int_to_ptr.hbm [resolvable:$true] %s254_s11  ;;  %s217_s14 = int_to_ptr.hbm [resolvable:$true] %s216_s14 }
   0x9   : > { %p987_p4 = pneg %p1366_p3  ;;  %s1303_s16 = smov [#allocation8]  }
   0xa   : > { %s256_s17 = sshll.u32 %s1303_s16, 4  ;;  %s1304_s18 = smov [#allocation3]   ;;  %s257_s17 = int_to_ptr.vmem [resolvable:$true] %s256_s17 }
   0xb   : > { %p1380_p5 = pnand %p1006_p2, %p987_p4  ;;  %s218_s19 = sshll.u32 %s1304_s18, 4  ;;  %s219_s19 = int_to_ptr.vmem [resolvable:$true] %s218_s19 }
   0xc   : > { %s239_s22 = sshll.u32 %s1533_s3, 4  ;;  %s1305_s23 = smov [#allocation7]   ;;  %s240_s22 = int_to_ptr.hbm [resolvable:$true] %s239_s22 }
   0xd   : > { %993 = dma.hbm_to_vmem [thread:$0]  (!%p1380_p5), %s229_s27, 32, %s231_s8, [#allocation6]  }
   0xe   : > { %999 = dma.hbm_to_vmem [thread:$0]  (!%p1380_p5), %s255_s11, 16, %s257_s17, [#allocation9]  }
   0xf   : > { %990 = dma.hbm_to_vmem [thread:$0]  (!%p1380_p5), %s217_s14, 32, %s219_s19, [#allocation4]  }
  0x10   : > { %s241_s25 = sshll.u32 %s1305_s23, 4  ;;  %s266_s27 = sshll.u32 %s1535_s5, 4  ;;  %s242_s25 = int_to_ptr.vmem [resolvable:$true] %s241_s25  ;;  %s267_s27 = int_to_ptr.hbm [resolvable:$true] %s266_s27 }
  0x11   : > { %s1306_s8 = smov 64   ;;  %s1307_s9 = smov 4  }
  0x12   : > { %996 = dma.hbm_to_vmem [thread:$0]  (!%p1380_p5), %s240_s22, 384, %s242_s25, [#allocation6], %s1306_s8, %s1306_s8, %s1307_s9  }
  0x13   : > { %s1308_s10 = smov [#allocation10]   ;;  %s277_s16 = sshll.u32 %s1536_s6, 4  ;;  %s278_s16 = int_to_ptr.hbm [resolvable:$true] %s277_s16 }
  0x14   : > { %s268_s11 = sshll.u32 %s1308_s10, 4  ;;  %s1309_s14 = smov [#allocation11]   ;;  %s269_s11 = int_to_ptr.vmem [resolvable:$true] %s268_s11 }
  0x15   : > { %1002 = dma.hbm_to_vmem [thread:$0]  (!%p1380_p5), %s267_s27, 16, %s269_s11, [#allocation9]  }
  0x16   : > { %s279_s17 = sshll.u32 %s1309_s14, 4  ;;  %303 = sbr.rel (%p1366_p3) target bundleno = 657 (0x291), region = 48  ;;  %s280_s17 = int_to_ptr.vmem [resolvable:$true] %s279_s17 }
  0x17   : > { %1005 = dma.hbm_to_vmem [thread:$0]  (!%p1380_p5), %s278_s16, 256, %s280_s17, [#allocation12], %s1306_s8, %s1306_s8, %s1307_s9  }
  0x1b   : > { %1271 = dma.done.wait (%p1006_p2), [#allocation4], 32  }
  0x1c   : > { %1273 = vsyncadd (%p1006_p2), [#allocation4], 4294967264 }
  0x1d   : > { %1275 = dma.done.wait (%p1006_p2), [#allocation6], 416  }
  0x1e   : > { %1277 = vsyncadd (%p1006_p2), [#allocation6], 4294966880 }
  0x1f   : > { %1279 = dma.done.wait (%p1006_p2), [#allocation9], 32  }
  0x20   : > { %1281 = vsyncadd (%p1006_p2), [#allocation9], 4294967264 }
  0x21   : > { %1283 = dma.done.wait (%p1006_p2), [#allocation12], 256  }
  0x22   : > { %1285 = vsyncadd (%p1006_p2), [#allocation12], 4294967040  ;;  %p360_p6 = scmp.lt.s32.totalorder %s1361_s28, 1  ;;  %vm371_vm0 = vcmask 24576   ;;  %v1310_v0 = vmov 0.0   ;;  %s1437_s25 = smov 0  }
  0x23   : > { %372 = vst.msk [vmem:[#allocation2 + $0x7] sm:$0x1] %vm371_vm0, %v1310_v0 }
  0x24   : > { %s1545_s28 = smov (!%p360_p6, %s1361_s28), 1  ;;  %373 = vst.msk [vmem:[#allocation2 + $0x18] sm:$0x1] %vm371_vm0, %v1310_v0 }
  0x25   : > { %s961_s29 = sshll.u32 %s1545_s28, 4  ;;  %s936_s15 = sshll.u32 %s1545_s28, 3 }
  0x26   : > { %s364_s20 = scalar_lea.vmem %s1530_s0, %s961_s29  ;;  %s1431_s23 = scalar_lea.vmem %s1537_s7, %s936_s15 }
  0x27   : > { %v369_v1 = vld [vmem:[%s364_s20] sm:$0xff]   ;;  %v370_v2 = vld [vmem:[%s364_s20 + $0x8] sm:$0xff]  }
  0x28 LB: >> { %vm386_vm1 = vcmask 31744   ;;  %v402_v4 = vmul.f32 %v1296_v1, %v1296_v1  ;;  %v403_v6 = vmul.f32 %v1292_v2, %v1292_v2  ;;  %s382_s28 = scalar_lea.vmem [#allocation3], %s1300_s25  ;;  %s384_s26 = scalar_lea.vmem [#allocation5], %s1300_s25  ;;  %v1311_v9 = vmov 4.0   ;;  %s1300_s25 = sphi %s1437_s25, %s379_s25   ;;  %v1296_v1 = vphi %v369_v1, %v1543_v1   ;;  %v1292_v2 = vphi %v370_v2, %v1542_v2  }
  0x29   : >> { %v387_v3 = vsel %vm386_vm1, %v1296_v1, 0.0  ;;  %v390_v7 = vsel %vm386_vm1, %v1292_v2, 0.0  ;;  %1062 = vrcp.f32 %v1311_v9  ;;  %s937_s30 = smul.u32 12, %s1300_s25  ;;  %vm470_vm3 = vcmask 1043456   ;;  %v1060_v44 = vld [vmem:[%s382_s28] ss:$0 sm:$0xff] }
  0x2a   : >> { %388 = vadd.xlane.f32.xlu0 %v387_v3  ;;  %v404_v5 = vsel %vm386_vm1, %v402_v4, 0.0  ;;  %v407_v8 = vsel %vm386_vm1, %v403_v6, 0.0  ;;  %v1061_v48 = vld [vmem:[%s384_s26] ss:$0 sm:$0xff]  ;;  %s379_s25 = sadd.s32 1, %s1300_s25  }
  0x2b   : >> { %405 = vadd.xlane.f32.xlu1 %v404_v5  ;;  %s462_s27 = scalar_lea.vmem [#allocation7], %s937_s30  ;;  %p376_p7 = scmp.ge.s32.totalorder %s379_s25, 2  }
  0x2c   : >> { %v463_v29 = vld [vmem:[%s462_s27] sm:$0xf]  ;;  %v942_v30 = vld [vmem:[%s462_s27 + $0x4] sm:$0xf]  ;;  %v947_v32 = vld [vmem:[%s462_s27 + $0x8] sm:$0xf] }
  0x2d   : >> { %938 = vmatpush.msk.msra.mxu0 %vm470_vm3, %v463_v29  ;;  %943 = vmatpush.msk.msra.mxu1 %vm470_vm3, %v942_v30 }
  0x2e   : >> { %962 = vmatpush.msk.msra.mxu3 %vm470_vm3, %v463_v29  ;;  %948 = vmatpush.msk.msra.mxu2 %vm470_vm3, %v947_v32 }
  0x2f   : >> { %v1063_v10 = vpop.eup %1062 }
  0x30   : >> { %v394_v11 = vmul.f32 4.0, %v1063_v10  ;;  %vm398_vm2 = vweird.f32 %v1063_v10 }
  0x32   : >> { %391 = vadd.xlane.f32.xlu0 %v390_v7  ;;  %v395_v12 = vsub.f32 1.0, %v394_v11 }
  0x33   : >> { %408 = vadd.xlane.f32.xlu1 %v407_v8 }
  0x34   : >> { %v396_v13 = vmul.f32 %v1063_v10, %v395_v12 }
  0x36   : >> { %v397_v14 = vadd.f32 %v1063_v10, %v396_v13 }
  0x38   : >> { %v1460_v15 = vsel %vm398_vm2, %v1063_v10, %v397_v14 }
  0x9d   : >> { %v389_v16 = vpop.xlane.xlu0 %388 }
  0x9e   : >> { %v400_v17 = vmul.f32 %v1460_v15, %v389_v16  ;;  %v406_v18 = vpop.xlane.xlu1 %405 }
  0x9f   : >> { %v410_v20 = vmul.f32 %v406_v18, %v1460_v15 }
  0xa0   : >> { %v412_v19 = vmul.f32 %v400_v17, %v400_v17  ;;  %v418_v42 = vsub.f32 %v1296_v1, %v400_v17 }
  0xa2   : >> { %v414_v21 = vsub.f32 %v410_v20, %v412_v19 }
  0xa4   : >> { %v416_v22 = vmax.f32 %v414_v21, 0.0 }
  0xa5   : >> { %v392_v23 = vpop.xlane.xlu0 %391 }
  0xa6   : >> { %v420_v24 = vadd.f32 1e-05, %v416_v22  ;;  %v401_v25 = vmul.f32 %v1460_v15, %v392_v23  ;;  %v409_v26 = vpop.xlane.xlu1 %408 }
  0xa7   : >> { %v411_v28 = vmul.f32 %v409_v26, %v1460_v15 }
  0xa8   : >> { %1064 = vrsqrt.f32 %v420_v24  ;;  %v413_v27 = vmul.f32 %v401_v25, %v401_v25  ;;  %vm428_vm5 = vweird.f32 %v420_v24  ;;  %v419_v55 = vsub.f32 %v1292_v2, %v401_v25 }
  0xaa   : >> { %v415_v31 = vsub.f32 %v411_v28, %v413_v27 }
  0xac   : >> { %v417_v33 = vmax.f32 %v415_v31, 0.0 }
  0xae   : >> { %v1065_v34 = vpop.eup %1064  ;;  %v421_v36 = vadd.f32 1e-05, %v417_v33 }
  0xaf   : >> { %v423_v35 = vmul.f32 %v1065_v34, %v420_v24  ;;  %vm429_vm4 = vweird.f32 %v1065_v34 }
  0xb0   : >> { %1066 = vrsqrt.f32 %v421_v36  ;;  %vm430_vm6 = vmor %vm428_vm5, %vm429_vm4  ;;  %vm438_vm8 = vweird.f32 %v421_v36  ;;  %vm779_vm5 = vcmask (%p376_p7), 64512  }
  0xb1   : >> { %v424_v37 = vmul.f32 %v1065_v34, %v423_v35 }
  0xb3   : >> { %v425_v38 = vmul.f32 0.5, %v424_v37 }
  0xb5   : >> { %v426_v39 = vsub.f32 1.5, %v425_v38  ;;  %v663_v38 = vld [vmem:[#allocation11] sm:$0xf] (%p376_p7) }
  0xb6   : >> { %v1067_v40 = vpop.eup %1066 }
  0xb7   : >> { %v427_v41 = vmul.f32 %v1065_v34, %v426_v39  ;;  %v433_v43 = vmul.f32 %v1067_v40, %v421_v36  ;;  %vm439_vm7 = vweird.f32 %v1067_v40  ;;  %v660_v39 = vld [vmem:[#allocation11 + $0x4] sm:$0xf] (%p376_p7) }
  0xb8   : >> { %vm440_vm10 = vmor %vm438_vm8, %vm439_vm7 }
  0xb9   : >> { %v431_v45 = vsel %vm430_vm6, %v1065_v34, %v427_v41  ;;  %v434_v46 = vmul.f32 %v1067_v40, %v433_v43 }
  0xba   : >> { %v442_v47 = vmul.f32 %v431_v45, %v418_v42  ;;  %v751_v42 = vld [vmem:[#allocation11 + $0xc] sm:$0xf] (%p376_p7) }
  0xbb   : >> { %v435_v49 = vmul.f32 0.5, %v434_v46 }
  0xbc   : >> { %v445_v50 = vmul.f32 %v1060_v44, %v442_v47 }
  0xbd   : >> { %v436_v51 = vsub.f32 1.5, %v435_v49 }
  0xbe   : >> { %v448_v52 = vadd.f32 %v1061_v48, %v445_v50 }
  0xbf   : >> { %v437_v53 = vmul.f32 %v1067_v40, %v436_v51  ;;  %v1068_v51 = vld [vmem:[#allocation8] ss:$0 sm:$0xff] (%p376_p7) }
  0xc0   : >> { %vm450_vm9 = vcmp.ge.f32.partialorder %v448_v52, 0.0  ;;  %v452_v54 = vmul.f32 0.01, %v448_v52 }
  0xc1   : >> { %v441_v56 = vsel %vm440_vm10, %v1067_v40, %v437_v53  ;;  %v720_v40 = vld [vmem:[#allocation11 + $0x8] sm:$0xf] (%p376_p7) }
  0xc2   : >> { %v454_v57 = vsel %vm450_vm9, %v448_v52, %v452_v54  ;;  %v443_v58 = vmul.f32 %v441_v56, %v419_v55  ;;  %v1069_v55 = vld [vmem:[#allocation10] ss:$0 sm:$0xff] (%p376_p7) }
  0xc3   : >> { %456 = vst.msk [vmem:[#allocation2 + $0x8] sm:$0xff] %vm386_vm1, %v454_v57 }
  0xc4   : >> { %v446_v59 = vmul.f32 %v1060_v44, %v443_v58 }
  0xc6   : >> { %v449_v60 = vadd.f32 %v1061_v48, %v446_v59 }
  0xc8   : >> { %vm451_vm11 = vcmp.ge.f32.partialorder %v449_v60, 0.0  ;;  %v453_v61 = vmul.f32 0.01, %v449_v60 }
  0xca   : >> { %v458_v62 = vld [vmem:[#allocation2 + $0x7] sm:$0xff]  ;;  %v455_v0 = vsel %vm451_vm11, %v449_v60, %v453_v61 }
  0xcb   : >> { %v499_v63 = vld [vmem:[#allocation2 + $0x8] sm:$0xff]  ;;  %939 = vmatmul.msk.f32.vlgmr.msra.gmra.mxu0 %vm386_vm1, %v458_v62  ;;  %457 = vst.msk [vmem:[#allocation2 + $0x10] sm:$0xff] %vm386_vm1, %v455_v0 }
  0xcc   : >> { %944 = vmatmul.msk.f32.vlgmr.msra.gmra.mxu1 %vm386_vm1, %v499_v63  ;;  %951 = vmatpush.msk.msra.mxu0 (%p376_p7), %vm470_vm3, %v663_v38 }
  0xcd   : > { %953 = vmatpush.msk.msra.mxu1 (%p376_p7), %vm470_vm3, %v660_v39 }
  0xd2   : >> { %v459_v3 = vld [vmem:[#allocation2 + $0xf] sm:$0xff] }
  0xd3   : >> { %v500_v4 = vld [vmem:[#allocation2 + $0x10] sm:$0xff]  ;;  %940 = vmatmul.msk.f32.vlgmr.msra.gmra.mxu3 %vm386_vm1, %v459_v3 }
  0xd4   : >> { %v539_v5 = vld [vmem:[#allocation2 + $0x9] sm:$0xff]  ;;  %945 = vmatmul.msk.f32.gmra.mxu1 %vm386_vm1, %v500_v4  ;;  %v540_v6 = vld [vmem:[#allocation2 + $0x11] sm:$0xff]  ;;  %957 = vmatpush.msk.msra.mxu3 (%p376_p7), %vm470_vm3, %v751_v42 }
  0xd5   : >> { %949 = vmatmul.msk.f32.vlgmr.msra.gmra.mxu2 %vm386_vm1, %v539_v5 }
  0xd6   : > { %955 = vmatpush.msk.msra.mxu2 (%p376_p7), %vm470_vm3, %v720_v40 }
  0xdd   : >> { %950 = vmatmul.msk.f32.gmra.mxu2 %vm386_vm1, %v540_v6 }
 0x148   : >> { %v491_v7 = vpop.f32.mrf.mxu0 }
 0x149   : >> { %v497_v8 = vadd.f32 %v1296_v1, %v491_v7  ;;  %v531_v9 = vpop.f32.mrf.mxu1 }
 0x14b   : >> { %v537_v10 = vadd.f32 %v531_v9, %v497_v8 }
 0x151   : >> { %v534_v16 = vpop.f32.mrf.mxu1 }
 0x156   : >> { %v494_v11 = vpop.f32.mrf.mxu3 }
 0x157   : >> { %v498_v14 = vadd.f32 %v1292_v2, %v494_v11 }
 0x158   : >> { %v571_v12 = vpop.f32.mrf.mxu2 }
 0x159   : >> { %v1486_v1 = vadd.f32 %v571_v12, %v537_v10   ;;  %v538_v17 = vadd.f32 %v534_v16, %v498_v14 }
 0x15b   : >> { %v1540_v13 = vmov %v1486_v1 }
 0x15c   : >> { %v1543_v1 = vmov %v1540_v13  ;;  %v597_v20 = vmul.f32 (%p376_p7), %v1540_v13, %v1540_v13 }
 0x15d   : > { %v582_v1 = vsel (%p376_p7), %vm386_vm1, %v1540_v13, 0.0 }
 0x15e   : > { %583 = vadd.xlane.f32.xlu0 (%p376_p7), %v582_v1  ;;  %v599_v21 = vsel (%p376_p7), %vm386_vm1, %v597_v20, 0.0 }
 0x15f   : > { %600 = vadd.xlane.f32.xlu1 (%p376_p7), %v599_v21 }
 0x160   : >> { %v574_v18 = vpop.f32.mrf.mxu2  ;;  %378 = sbr.rel (!%p376_p7) target bundleno = 40 (0x28), region = 122 }
 0x161   : >> { %v1489_v2 = vadd.f32 %v574_v18, %v538_v17  }
 0x163   : >> { %v1541_v19 = vmov %v1489_v2 }
 0x164   : >> { %v1542_v2 = vmov %v1541_v19  ;;  %v598_v22 = vmul.f32 (%p376_p7), %v1541_v19, %v1541_v19  ;;  %v585_v23 = vsel (%p376_p7), %vm386_vm1, %v1541_v19, 0.0 }
 0x166   : > { %v602_v24 = vsel %vm386_vm1, %v598_v22, 0.0  ;;  %586 = vadd.xlane.f32.xlu0 %v585_v23 }
 0x167   : > { %603 = vadd.xlane.f32.xlu1 %v602_v24 }
 0x1d1   : > { %v584_v2 = vpop.xlane.xlu0 %583 }
 0x1d2   : > { %v595_v25 = vmul.f32 %v584_v2, %v1460_v15  ;;  %v601_v26 = vpop.xlane.xlu1 %600 }
 0x1d3   : > { %v605_v28 = vmul.f32 %v601_v26, %v1460_v15 }
 0x1d4   : > { %v607_v27 = vmul.f32 %v595_v25, %v595_v25  ;;  %v613_v50 = vsub.f32 %v1540_v13, %v595_v25 }
 0x1d6   : > { %v609_v29 = vsub.f32 %v605_v28, %v607_v27 }
 0x1d8   : > { %v611_v30 = vmax.f32 %v609_v29, 0.0 }
 0x1d9   : > { %v587_v31 = vpop.xlane.xlu0 %586 }
 0x1da   : > { %v615_v32 = vadd.f32 1e-05, %v611_v30  ;;  %v596_v33 = vmul.f32 %v587_v31, %v1460_v15  ;;  %v604_v34 = vpop.xlane.xlu1 %603 }
 0x1db   : > { %v606_v36 = vmul.f32 %v604_v34, %v1460_v15 }
 0x1dc   : > { %1070 = vrsqrt.f32 %v615_v32  ;;  %v608_v35 = vmul.f32 %v596_v33, %v596_v33  ;;  %vm623_vm13 = vweird.f32 %v615_v32  ;;  %v614_v63 = vsub.f32 %v1541_v19, %v596_v33 }
 0x1de   : > { %v610_v37 = vsub.f32 %v606_v36, %v608_v35 }
 0x1e0   : > { %v612_v41 = vmax.f32 %v610_v37, 0.0 }
 0x1e2   : > { %v1071_v43 = vpop.eup %1070  ;;  %v616_v45 = vadd.f32 1e-05, %v612_v41 }
 0x1e3   : > { %v618_v44 = vmul.f32 %v1071_v43, %v615_v32  ;;  %vm624_vm12 = vweird.f32 %v1071_v43 }
 0x1e4   : > { %1072 = vrsqrt.f32 %v616_v45  ;;  %vm625_vm14 = vmor %vm623_vm13, %vm624_vm12  ;;  %vm633_vm2 = vweird.f32 %v616_v45 }
 0x1e5   : > { %v619_v46 = vmul.f32 %v1071_v43, %v618_v44 }
 0x1e7   : > { %v620_v15 = vmul.f32 0.5, %v619_v46 }
 0x1e9   : > { %v621_v47 = vsub.f32 1.5, %v620_v15 }
 0x1ea   : > { %v1073_v48 = vpop.eup %1072 }
 0x1eb   : > { %v622_v49 = vmul.f32 %v1071_v43, %v621_v47  ;;  %v628_v52 = vmul.f32 %v1073_v48, %v616_v45  ;;  %vm634_vm15 = vweird.f32 %v1073_v48 }
 0x1ec   : > { %vm635_vm3 = vmor %vm633_vm2, %vm634_vm15 }
 0x1ed   : > { %v626_v53 = vsel %vm625_vm14, %v1071_v43, %v622_v49  ;;  %v629_v56 = vmul.f32 %v1073_v48, %v628_v52 }
 0x1ee   : > { %v637_v54 = vmul.f32 %v626_v53, %v613_v50 }
 0x1ef   : > { %v630_v58 = vmul.f32 0.5, %v629_v56 }
 0x1f0   : > { %v642_v57 = vmul.f32 %v1068_v51, %v637_v54 }
 0x1f1   : > { %v631_v60 = vsub.f32 1.5, %v630_v58 }
 0x1f2   : > { %v647_v59 = vadd.f32 %v1069_v55, %v642_v57 }
 0x1f3   : > { %v632_v62 = vmul.f32 %v1073_v48, %v631_v60 }
 0x1f4   : > { %vm649_vm0 = vcmp.ge.f32.partialorder %v647_v59, 0.0  ;;  %v651_v61 = vmul.f32 0.01, %v647_v59 }
 0x1f5   : > { %v636_v3 = vsel %vm635_vm3, %v1073_v48, %v632_v62 }
 0x1f6   : > { %v653_v0 = vsel %vm649_vm0, %v647_v59, %v651_v61  ;;  %v638_v4 = vmul.f32 %v636_v3, %v614_v63 }
 0x1f7   : > { %655 = vst.msk [vmem:[#allocation2 + $0x8] sm:$0xff] %vm386_vm1, %v653_v0 }
 0x1f8   : > { %v643_v5 = vmul.f32 %v1068_v51, %v638_v4 }
 0x1fa   : > { %v648_v6 = vadd.f32 %v1069_v55, %v643_v5 }
 0x1fc   : > { %vm650_vm4 = vcmp.ge.f32.partialorder %v648_v6, 0.0  ;;  %v652_v7 = vmul.f32 0.01, %v648_v6 }
 0x1fe   : > { %v654_v8 = vsel %vm650_vm4, %v648_v6, %v652_v7 }
 0x1ff   : > { %656 = vst.msk [vmem:[#allocation2 + $0x10] sm:$0xff] %vm386_vm1, %v654_v8 }
 0x206   : > { %v662_v9 = vld [vmem:[#allocation2 + $0x7] ss:$2 sm:$0xff]  ;;  %v658_v10 = vld [vmem:[#allocation2 + $0x8] ss:$2 sm:$0xff] }
 0x207   : > { %v718_v11 = vld [vmem:[#allocation2 + $0x9] ss:$2 sm:$0xff]  ;;  %952 = vmatmul.msk.f32.vlgmr.msra.gmra.mxu0 %vm386_vm1, %v662_v9  ;;  %954 = vmatmul.msk.f32.vlgmr.msra.gmra.mxu1 %vm386_vm1, %v658_v10  ;;  %v749_v12 = vld [vmem:[#allocation2 + $0xa] ss:$2 sm:$0xff] }
 0x208   : > { %956 = vmatmul.msk.f32.vlgmr.msra.gmra.mxu2 %vm386_vm1, %v718_v11  ;;  %958 = vmatmul.msk.f32.vlgmr.msra.gmra.mxu3 %vm386_vm1, %v749_v12 }
 0x284   : > { %v688_v13 = vpop.f32.mrf.mxu0  ;;  %v714_v14 = vpop.f32.mrf.mxu1 }
 0x285   : > { %v715_v16 = vadd.f32 %v714_v14, %v688_v13 }
 0x28b   : > { %v744_v17 = vpop.f32.mrf.mxu2  ;;  %v775_v19 = vpop.f32.mrf.mxu3 }
 0x28c   : > { %v747_v18 = vadd.f32 %v744_v17, %v715_v16 }
 0x28e   : > { %v778_v1 = vadd.f32 %v775_v19, %v747_v18 }
 0x290   : > { %780 = vst.msk [vmem:[%s1431_s23] sm:$0xff] %vm779_vm5, %v778_v1 }
 0x291 PF: > { %s21_s24 = sadd.s32 1, %s1288_s24  }
 0x292   : > { %p18_p8 = scmp.ge.s32.totalorder %s21_s24, 4  }
 0x294   :  { %20 = sbr.rel (!%p18_p8) target bundleno = 4 (0x4), region = 133 }
 0x299   :  { %800 = vsyncpa [#allocation4], 1 }
 0x29a   :  { %802 = vsyncpa [#allocation4 + $0x1], 1 }
 0x29b   :  { %803 = vsyncpa [#allocation6], 1 }
 0x29c   :  { %804 = vsyncpa [#allocation9], 1 }
 0x29d   :  { %805 = vsyncpa [#allocation12], 1 }

</bundles_post_ra>
